<compile_context>
chip_gen: v7x
topology: tpu7x:2x2x1
jax: 0.10.0
libtpu: 0.0.40
codegen_flags: <defaults>
</compile_context>

<pallas_src>
import jax
import jax.numpy as jnp
from jax.experimental import pallas as pl
from jax.experimental.pallas import tpu as pltpu


# ----------------------------------------------------------------------------
# Kernel 1: decode-step-invariant encoder projection  h_m = memory @ W2
# (bias b2 is folded into b12 used in the step kernel).
# ----------------------------------------------------------------------------
def encoder_proj_kernel(mem_ref, w2_ref, hm_ref):
    mem_bf = mem_ref[...].astype(jnp.bfloat16)                       # (B*S, H)
    hm_ref[...] = jnp.dot(mem_bf, w2_ref[...],
                          preferred_element_type=jnp.float32)        # (B*S, H) f32


def precompute_encoder_proj(encoder_outputs, params):
    """Run once per sequence; reuse h_m across all decode steps."""
    B, S, H = encoder_outputs.shape
    mem2d = encoder_outputs.reshape(B * S, H)
    vmem = pl.BlockSpec(memory_space=pltpu.MemorySpace.VMEM)
    hm = pl.pallas_call(
        encoder_proj_kernel,
        out_shape=jax.ShapeDtypeStruct((B * S, H), jnp.float32),
        in_specs=[vmem, vmem],
        out_specs=vmem,
        # TODO(synk): for long sequences / large H, grid over the B*S rows instead of
        # keeping the whole projection VMEM-resident (v7x has only 64 MiB VMEM).
    )(mem2d, params['w2'])
    return hm.reshape(B, S, H)


# ----------------------------------------------------------------------------
# Kernel 2: attention + GRU cell (one decode step).
# ----------------------------------------------------------------------------
def decoder_step_kernel(
    hidden_ref, hm_ref, mem_ref, wvec_ref,
    w1_ref, b12_ref, wv_ref,
    wih_ctx_ref, wih_emb_ref, whh_ref, bih_ref, bhh_ref,
    bv_ref,                                   # SMEM scalar
    newh_ref, score_ref,
):
    H = hidden_ref.shape[1]
    h = hidden_ref[...]                       # (B, H) f32
    h_bf = h.astype(jnp.bfloat16)

    # ---- Bah_Attn: v * tanh(W1*x + b1 + W2*memory + b2) ---------------------
    h_x = jnp.dot(h_bf, w1_ref[...],
                  preferred_element_type=jnp.float32) + b12_ref[...]          # (B, H)
    e = jnp.tanh(h_x[:, None, :] + hm_ref[...])                               # (B, S, H)

    # score logits: VPU multiply + lane reduce (avoid width-1 MXU matvec)
    s = jnp.sum(e * wv_ref[...], axis=-1) + bv_ref[0]                         # (B, S)

    # softmax over S
    s = s - jnp.max(s, axis=-1, keepdims=True)
    p = jnp.exp(s)
    score = p * pl.reciprocal(jnp.sum(p, axis=-1, keepdims=True), approx=True)

    # context = sum_s score * memory   (S is small: keep on VPU/XLU)
    mem = mem_ref[...]                                                        # (B, S, H)
    context = jnp.sum(score[:, :, None] * mem, axis=1)                        # (B, H)

    # ---- GRUCell([context ; word_vec], hidden) — concat replaced by 2 matmuls
    ctx_bf = context.astype(jnp.bfloat16)
    wv_bf = wvec_ref[...].astype(jnp.bfloat16)
    gi = (jnp.dot(ctx_bf, wih_ctx_ref[...], preferred_element_type=jnp.float32)
          + jnp.dot(wv_bf, wih_emb_ref[...], preferred_element_type=jnp.float32)
          + bih_ref[...])                                                     # (B, 3H)
    gh = jnp.dot(h_bf, whh_ref[...],
                 preferred_element_type=jnp.float32) + bhh_ref[...]           # (B, 3H)

    # H is a multiple of 128 -> these lane slices are aligned (no masked relayout)
    r = jax.nn.sigmoid(gi[:, 0:H] + gh[:, 0:H])
    z = jax.nn.sigmoid(gi[:, H:2 * H] + gh[:, H:2 * H])
    n = jnp.tanh(gi[:, 2 * H:3 * H] + r * gh[:, 2 * H:3 * H])
    h_new = (1.0 - z) * n + z * h                                             # (B, H)

    newh_ref[...] = h_new
    score_ref[...] = score


def decoder_step(word_vec, hidden, encoder_outputs, h_m, params):
    B, H = hidden.shape
    S = encoder_outputs.shape[1]

    vmem = pl.BlockSpec(memory_space=pltpu.MemorySpace.VMEM)
    smem = pl.BlockSpec(memory_space=pltpu.MemorySpace.SMEM)

    inputs = (
        hidden, h_m, encoder_outputs, word_vec,
        params['w1'], params['b12'], params['wv'],
        params['wih_ctx_t'], params['wih_emb_t'], params['whh_t'],
        params['bih'], params['bhh'],
        params['bv'],
    )
    new_hidden, score = pl.pallas_call(
        decoder_step_kernel,
        out_shape=(jax.ShapeDtypeStruct((B, H), jnp.float32),
                   jax.ShapeDtypeStruct((B, S), jnp.float32)),
        in_specs=[vmem] * 12 + [smem],
        out_specs=(vmem, vmem),
        input_output_aliases={0: 0},     # hidden buffer reused for new_hidden
    )(*inputs)
    return new_hidden, score


# ----------------------------------------------------------------------------
# Kernel 3: vocabulary projection, gridded over V (lane-dense tiles, pipelined,
# "parallel" axis so v7x's two TensorCores split the wo streaming).
# ----------------------------------------------------------------------------
def vocab_proj_kernel(h_ref, wo_ref, bo_ref, pred_ref):
    h_bf = h_ref[...].astype(jnp.bfloat16)
    pred_ref[...] = (jnp.dot(h_bf, wo_ref[...],
                             preferred_element_type=jnp.float32) + bo_ref[...])


def vocab_projection(h_new, params, tile_v=256):
    B, H = h_new.shape
    V = params['wo'].shape[1]
    tile_v = tile_v if V % tile_v == 0 else V          # lane-dense tile (>=128)
    grid = (V // tile_v,)
    return pl.pallas_call(
        vocab_proj_kernel,
        out_shape=jax.ShapeDtypeStruct((B, V), jnp.float32),
        grid=grid,
        in_specs=[
            pl.BlockSpec((B, H), lambda j: (0, 0)),        # h_new, same block each tile
            pl.BlockSpec((H, tile_v), lambda j: (0, j)),   # wo tile (double-buffered)
            pl.BlockSpec((1, tile_v), lambda j: (0, j)),   # bo tile
        ],
        out_specs=pl.BlockSpec((B, tile_v), lambda j: (0, j)),
        compiler_params=pltpu.CompilerParams(
            dimension_semantics=("parallel",)),
    )(h_new, params['wo'], params['bo'])


# ----------------------------------------------------------------------------
# Top-level forward (embedding gather is plain-JAX glue).
# ----------------------------------------------------------------------------
def decoder_forward(word, hidden, encoder_outputs, params):
    # In a real decode loop, call precompute_encoder_proj once per sequence and
    # reuse h_m for every step; it is included here so one call == one forward.
    h_m = precompute_encoder_proj(encoder_outputs, params)
    word_vec = params['emb'][word]                     # nn.Embedding lookup (glue)
    new_hidden, score = decoder_step(word_vec, hidden, encoder_outputs, h_m, params)
    pred = vocab_projection(new_hidden, params)
    return pred, new_hidden, score


# ----------------------------------------------------------------------------
# Parameters (weights stored transposed for x @ W; MXU operands stored in bf16).
# ----------------------------------------------------------------------------
def init_params(key, voc_size, emb_size, hidden_size):
    H, E, V = hidden_size, emb_size, voc_size
    ks = jax.random.split(key, 12)
    scale = 0.1
    f32, bf16 = jnp.float32, jnp.bfloat16

    emb = jax.random.normal(ks[0], (V, E), f32) * scale
    emb = emb.at[0].set(0.0)                                   # padding_idx=0

    w1 = jax.random.normal(ks[1], (H, H), f32) * scale         # Bah_Attn.lin1^T
    b1 = jax.random.normal(ks[2], (1, H), f32) * scale
    w2 = jax.random.normal(ks[3], (H, H), f32) * scale         # Bah_Attn.lin2^T
    b2 = jax.random.normal(ks[4], (1, H), f32) * scale
    wv = jax.random.normal(ks[5], (1, H), f32) * scale         # Bah_Attn.v weight (row)
    bv = jax.random.normal(ks[6], (1,), f32) * scale

    wih_t = jax.random.normal(ks[7], (H + E, 3 * H), f32) * scale   # GRUCell weight_ih^T
    whh_t = jax.random.normal(ks[8], (H, 3 * H), f32) * scale       # GRUCell weight_hh^T
    bih = jax.random.normal(ks[9], (1, 3 * H), f32) * scale
    bhh = jax.random.normal(ks[10], (1, 3 * H), f32) * scale

    wo = jax.random.normal(ks[11], (H, V), f32) * scale             # out Linear^T
    bo = jnp.zeros((1, V), f32)

    return {
        'emb': emb,
        'w1': w1.astype(bf16),
        'w2': w2.astype(bf16),
        'b12': b1 + b2,                        # b2 folded into b1 (added once on (B,H))
        'wv': wv,                              # VPU operand, keep f32
        'bv': bv,                              # SMEM scalar
        'wih_ctx_t': wih_t[:H].astype(bf16),   # rows multiplying the attention context
        'wih_emb_t': wih_t[H:].astype(bf16),   # rows multiplying the word embedding
        'whh_t': whh_t.astype(bf16),
        'bih': bih,
        'bhh': bhh,
        'wo': wo.astype(bf16),
        'bo': bo,
    }


# ----------------------------------------------------------------------------
# Pure-JAX f32 reference (mirrors the PyTorch semantics) for a sanity check.
# ----------------------------------------------------------------------------
def decoder_reference(word, hidden, encoder_outputs, params):
    H = hidden.shape[1]
    f = lambda x: x.astype(jnp.float32)
    word_vec = params['emb'][word]
    h_x = hidden @ f(params['w1']) + params['b12']
    h_m = jnp.einsum('bsh,hk->bsk', encoder_outputs, f(params['w2']))
    e = jnp.tanh(h_x[:, None, :] + h_m)
    s = jnp.sum(e * params['wv'], axis=-1) + params['bv'][0]
    score = jax.nn.softmax(s, axis=-1)
    context = jnp.sum(score[:, :, None] * encoder_outputs, axis=1)
    gi = (context @ f(params['wih_ctx_t']) + word_vec @ f(params['wih_emb_t'])
          + params['bih'])
    gh = hidden @ f(params['whh_t']) + params['bhh']
    r = jax.nn.sigmoid(gi[:, :H] + gh[:, :H])
    z = jax.nn.sigmoid(gi[:, H:2 * H] + gh[:, H:2 * H])
    n = jnp.tanh(gi[:, 2 * H:] + r * gh[:, 2 * H:])
    h_new = (1.0 - z) * n + z * hidden
    pred = h_new @ f(params['wo']) + params['bo']
    return pred, h_new, score


if __name__ == "__main__":
    # Small but lane-aligned shapes (H, E, V multiples of 128; B multiple of 8).
    B, S, H, E, V = 8, 8, 128, 128, 1024

    key = jax.random.PRNGKey(0)
    kp, kw, kh, km = jax.random.split(key, 4)

    params = init_params(kp, voc_size=V, emb_size=E, hidden_size=H)
    word = jax.random.randint(kw, (B,), 1, V)                            # (B,) token ids
    hidden = jax.random.normal(kh, (B, H), jnp.float32)                  # (B, H)
    encoder_outputs = jax.random.normal(km, (B, S, H), jnp.float32)      # (B, S, H)

    fwd = jax.jit(decoder_forward)
    pred, new_hidden, score = fwd(word, hidden, encoder_outputs, params)
    jax.block_until_ready((pred, new_hidden, score))

    pred_r, newh_r, score_r = decoder_reference(word, hidden, encoder_outputs, params)
    # bf16 MXU operands with f32 accumulation -> relaxed tolerances vs f32 reference.
    assert jnp.allclose(score, score_r, atol=2e-2, rtol=2e-2), "score mismatch"
    assert jnp.allclose(new_hidden, newh_r, atol=3e-2, rtol=3e-2), "hidden mismatch"
    assert jnp.allclose(pred, pred_r, atol=3e-2, rtol=3e-2), "pred mismatch"

    print("KERNEL_OK")
</pallas_src>

<mosaic_0001>
module attributes {stable_mosaic.version = 11 : i64} {
  func.func @encoder_proj_kernel(%arg0: memref<64x128xf32, #tpu.memory_space<vmem>>, %arg1: memref<128x128xbf16, #tpu.memory_space<vmem>>, %arg2: memref<64x128xf32, #tpu.memory_space<vmem>>) attributes {dimension_semantics = [], scalar_prefetch = 0 : i64, scratch_operands = 0 : i64, tpu.core_type = #tpu.core_type<tc>} {
    %c0 = arith.constant 0 : index
    %c0_0 = arith.constant 0 : index
    %0 = vector.load %arg0[%c0, %c0_0] : memref<64x128xf32, #tpu.memory_space<vmem>>, vector<64x128xf32>
    %1 = arith.truncf %0 : vector<64x128xf32> to vector<64x128xbf16>
    %c0_1 = arith.constant 0 : index
    %c0_2 = arith.constant 0 : index
    %2 = vector.load %arg1[%c0_1, %c0_2] : memref<128x128xbf16, #tpu.memory_space<vmem>>, vector<128x128xbf16>
    %cst = arith.constant dense<0.000000e+00> : vector<64x128xf32>
    %3 = tpu.matmul %1, %2, %cst {dimension_numbers = #tpu.dot_dimension_numbers<[1], [0], [0], [1], [0, 0, 1, 1], [], []>} : vector<64x128xbf16>, vector<128x128xbf16>, vector<64x128xf32> -> vector<64x128xf32>
    %c0_3 = arith.constant 0 : index
    %c0_4 = arith.constant 0 : index
    %4 = vector.load %arg2[%c0_3, %c0_4] : memref<64x128xf32, #tpu.memory_space<vmem>>, vector<64x128xf32>
    tpu.vector_store %arg2[%c0_3, %c0_4], %3 {strides = array<i32>} : memref<64x128xf32, #tpu.memory_space<vmem>>, vector<64x128xf32>,
    return
  }
}

module attributes {stable_mosaic.version = 11 : i64} {
  func.func @vocab_proj_kernel(%arg0: i32, %arg1: memref<8x128xf32, #tpu.memory_space<vmem>>, %arg2: memref<128x256xbf16, #tpu.memory_space<vmem>>, %arg3: memref<1x256xf32, #tpu.memory_space<vmem>>, %arg4: memref<8x256xf32, #tpu.memory_space<vmem>>) attributes {dimension_semantics = [#tpu.dimension_semantics<parallel>], iteration_bounds = array<i64: 4>, scalar_prefetch = 0 : i64, scratch_operands = 0 : i64, tpu.core_type = #tpu.core_type<tc>, window_params = [{pipeline_mode = #tpu.pipeline_mode<synchronous>, transform_indices = @transform_0, window_bounds = array<i64: 8, 128>}, {transform_indices = @transform_1, window_bounds = array<i64: 128, 256>}, {transform_indices = @transform_2, window_bounds = array<i64: 1, 256>}, {transform_indices = @transform_3, window_bounds = array<i64: 8, 256>}]} {
    %c0 = arith.constant 0 : index
    %c0_0 = arith.constant 0 : index
    %0 = vector.load %arg1[%c0, %c0_0] : memref<8x128xf32, #tpu.memory_space<vmem>>, vector<8x128xf32>
    %1 = arith.truncf %0 : vector<8x128xf32> to vector<8x128xbf16>
    %c0_1 = arith.constant 0 : index
    %c0_2 = arith.constant 0 : index
    %2 = vector.load %arg2[%c0_1, %c0_2] : memref<128x256xbf16, #tpu.memory_space<vmem>>, vector<128x256xbf16>
    %cst = arith.constant dense<0.000000e+00> : vector<8x256xf32>
    %3 = tpu.matmul %1, %2, %cst {dimension_numbers = #tpu.dot_dimension_numbers<[1], [0], [0], [1], [0, 0, 1, 1], [], []>} : vector<8x128xbf16>, vector<128x256xbf16>, vector<8x256xf32> -> vector<8x256xf32>
    %c0_3 = arith.constant 0 : index
    %c0_4 = arith.constant 0 : index
    %4 = vector.load %arg3[%c0_3, %c0_4] : memref<1x256xf32, #tpu.memory_space<vmem>>, vector<1x256xf32>
    %5 = vector.broadcast %4 : vector<1x256xf32> to vector<8x256xf32>
    %6 = arith.addf %3, %5 : vector<8x256xf32>
    %c0_5 = arith.constant 0 : index
    %c0_6 = arith.constant 0 : index
    %7 = vector.load %arg4[%c0_5, %c0_6] : memref<8x256xf32, #tpu.memory_space<vmem>>, vector<8x256xf32>
    tpu.vector_store %arg4[%c0_5, %c0_6], %6 {strides = array<i32>} : memref<8x256xf32, #tpu.memory_space<vmem>>, vector<8x256xf32>,
    return
  }
  func.func @transform_0(%arg0: i32) -> (i32, i32) {
    %c0_i32 = arith.constant 0 : i32
    %c0_i32_0 = arith.constant 0 : i32
    %c0_i32_1 = arith.constant 0 : i32
    return %c0_i32, %c0_i32_0 : i32, i32
  }
  func.func @transform_1(%arg0: i32) -> (i32, i32) {
    %c0_i32 = arith.constant 0 : i32
    %c0_i32_0 = arith.constant 0 : i32
    return %c0_i32, %arg0 : i32, i32
  }
  func.func @transform_2(%arg0: i32) -> (i32, i32) {
    %c0_i32 = arith.constant 0 : i32
    %c0_i32_0 = arith.constant 0 : i32
    return %c0_i32, %arg0 : i32, i32
  }
  func.func @transform_3(%arg0: i32) -> (i32, i32) {
    %c0_i32 = arith.constant 0 : i32
    %c0_i32_0 = arith.constant 0 : i32
    return %c0_i32, %arg0 : i32, i32
  }
}

module attributes {stable_mosaic.version = 11 : i64} {
  func.func @decoder_step_kernel(%arg0: memref<8x128xf32, #tpu.memory_space<vmem>>, %arg1: memref<8x8x128xf32, #tpu.memory_space<vmem>>, %arg2: memref<8x8x128xf32, #tpu.memory_space<vmem>>, %arg3: memref<8x128xf32, #tpu.memory_space<vmem>>, %arg4: memref<128x128xbf16, #tpu.memory_space<vmem>>, %arg5: memref<1x128xf32, #tpu.memory_space<vmem>>, %arg6: memref<1x128xf32, #tpu.memory_space<vmem>>, %arg7: memref<128x384xbf16, #tpu.memory_space<vmem>>, %arg8: memref<128x384xbf16, #tpu.memory_space<vmem>>, %arg9: memref<128x384xbf16, #tpu.memory_space<vmem>>, %arg10: memref<1x384xf32, #tpu.memory_space<vmem>>, %arg11: memref<1x384xf32, #tpu.memory_space<vmem>>, %arg12: memref<1xf32, #tpu.memory_space<smem>>, %arg13: memref<8x128xf32, #tpu.memory_space<vmem>>, %arg14: memref<8x8xf32, #tpu.memory_space<vmem>>) attributes {dimension_semantics = [], scalar_prefetch = 0 : i64, scratch_operands = 0 : i64, tpu.core_type = #tpu.core_type<tc>} {
    %c0 = arith.constant 0 : index
    %c0_0 = arith.constant 0 : index
    %0 = vector.load %arg0[%c0, %c0_0] : memref<8x128xf32, #tpu.memory_space<vmem>>, vector<8x128xf32>
    %1 = arith.truncf %0 : vector<8x128xf32> to vector<8x128xbf16>
    %c0_1 = arith.constant 0 : index
    %c0_2 = arith.constant 0 : index
    %2 = vector.load %arg4[%c0_1, %c0_2] : memref<128x128xbf16, #tpu.memory_space<vmem>>, vector<128x128xbf16>
    %cst = arith.constant dense<0.000000e+00> : vector<8x128xf32>
    %3 = tpu.matmul %1, %2, %cst {dimension_numbers = #tpu.dot_dimension_numbers<[1], [0], [0], [1], [0, 0, 1, 1], [], []>} : vector<8x128xbf16>, vector<128x128xbf16>, vector<8x128xf32> -> vector<8x128xf32>
    %c0_3 = arith.constant 0 : index
    %c0_4 = arith.constant 0 : index
    %4 = vector.load %arg5[%c0_3, %c0_4] : memref<1x128xf32, #tpu.memory_space<vmem>>, vector<1x128xf32>
    %5 = vector.broadcast %4 : vector<1x128xf32> to vector<8x128xf32>
    %6 = arith.addf %3, %5 : vector<8x128xf32>
    %7 = vector.shape_cast %6 : vector<8x128xf32> to vector<8x1x128xf32>
    %c0_5 = arith.constant 0 : index
    %c0_6 = arith.constant 0 : index
    %c0_7 = arith.constant 0 : index
    %8 = vector.load %arg1[%c0_5, %c0_6, %c0_7] : memref<8x8x128xf32, #tpu.memory_space<vmem>>, vector<8x8x128xf32>
    %9 = vector.broadcast %7 : vector<8x1x128xf32> to vector<8x8x128xf32>
    %10 = arith.addf %9, %8 : vector<8x8x128xf32>
    %11 = math.tanh %10 : vector<8x8x128xf32>
    %c0_8 = arith.constant 0 : index
    %c0_9 = arith.constant 0 : index
    %12 = vector.load %arg6[%c0_8, %c0_9] : memref<1x128xf32, #tpu.memory_space<vmem>>, vector<1x128xf32>
    %13 = vector.shape_cast %12 : vector<1x128xf32> to vector<1x1x128xf32>
    %14 = vector.broadcast %13 : vector<1x1x128xf32> to vector<8x8x128xf32>
    %15 = arith.mulf %11, %14 : vector<8x8x128xf32>
    %cst_10 = arith.constant dense<0.000000e+00> : vector<8x8xf32>
    %16 = vector.multi_reduction <add>, %15, %cst_10 [2] : vector<8x8x128xf32> to vector<8x8xf32>
    %c0_11 = arith.constant 0 : index
    %17 = memref.load %arg12[%c0_11] : memref<1xf32, #tpu.memory_space<smem>>
    %18 = vector.broadcast %17 : f32 to vector<8x8xf32>
    %19 = arith.addf %16, %18 : vector<8x8xf32>
    %cst_12 = arith.constant dense<0xFF800000> : vector<8xf32>
    %20 = vector.multi_reduction <maximumf>, %19, %cst_12 [1] : vector<8x8xf32> to vector<8xf32>
    %21 = vector.shape_cast %20 : vector<8xf32> to vector<8x1xf32>
    %22 = vector.broadcast %21 : vector<8x1xf32> to vector<8x8xf32>
    %23 = arith.subf %19, %22 : vector<8x8xf32>
    %24 = math.exp %23 : vector<8x8xf32>
    %cst_13 = arith.constant dense<0.000000e+00> : vector<8xf32>
    %25 = vector.multi_reduction <add>, %24, %cst_13 [1] : vector<8x8xf32> to vector<8xf32>
    %26 = vector.shape_cast %25 : vector<8xf32> to vector<8x1xf32>
    %27 = tpu.reciprocal %26 {approx = true} : vector<8x1xf32> -> vector<8x1xf32>
    %28 = vector.broadcast %27 : vector<8x1xf32> to vector<8x8xf32>
    %29 = arith.mulf %24, %28 : vector<8x8xf32>
    %c0_14 = arith.constant 0 : index
    %c0_15 = arith.constant 0 : index
    %c0_16 = arith.constant 0 : index
    %30 = vector.load %arg2[%c0_14, %c0_15, %c0_16] : memref<8x8x128xf32, #tpu.memory_space<vmem>>, vector<8x8x128xf32>
    %31 = vector.shape_cast %29 : vector<8x8xf32> to vector<8x8x1xf32>
    %32 = vector.broadcast %31 : vector<8x8x1xf32> to vector<8x8x128xf32>
    %33 = arith.mulf %32, %30 : vector<8x8x128xf32>
    %cst_17 = arith.constant dense<0.000000e+00> : vector<8x128xf32>
    %34 = vector.multi_reduction <add>, %33, %cst_17 [1] : vector<8x8x128xf32> to vector<8x128xf32>
    %35 = arith.truncf %34 : vector<8x128xf32> to vector<8x128xbf16>
    %c0_18 = arith.constant 0 : index
    %c0_19 = arith.constant 0 : index
    %36 = vector.load %arg3[%c0_18, %c0_19] : memref<8x128xf32, #tpu.memory_space<vmem>>, vector<8x128xf32>
    %37 = arith.truncf %36 : vector<8x128xf32> to vector<8x128xbf16>
    %c0_20 = arith.constant 0 : index
    %c0_21 = arith.constant 0 : index
    %38 = vector.load %arg7[%c0_20, %c0_21] : memref<128x384xbf16, #tpu.memory_space<vmem>>, vector<128x384xbf16>
    %cst_22 = arith.constant dense<0.000000e+00> : vector<8x384xf32>
    %39 = tpu.matmul %35, %38, %cst_22 {dimension_numbers = #tpu.dot_dimension_numbers<[1], [0], [0], [1], [0, 0, 1, 1], [], []>} : vector<8x128xbf16>, vector<128x384xbf16>, vector<8x384xf32> -> vector<8x384xf32>
    %c0_23 = arith.constant 0 : index
    %c0_24 = arith.constant 0 : index
    %40 = vector.load %arg8[%c0_23, %c0_24] : memref<128x384xbf16, #tpu.memory_space<vmem>>, vector<128x384xbf16>
    %cst_25 = arith.constant dense<0.000000e+00> : vector<8x384xf32>
    %41 = tpu.matmul %37, %40, %cst_25 {dimension_numbers = #tpu.dot_dimension_numbers<[1], [0], [0], [1], [0, 0, 1, 1], [], []>} : vector<8x128xbf16>, vector<128x384xbf16>, vector<8x384xf32> -> vector<8x384xf32>
    %42 = arith.addf %39, %41 : vector<8x384xf32>
    %c0_26 = arith.constant 0 : index
    %c0_27 = arith.constant 0 : index
    %43 = vector.load %arg10[%c0_26, %c0_27] : memref<1x384xf32, #tpu.memory_space<vmem>>, vector<1x384xf32>
    %44 = vector.broadcast %43 : vector<1x384xf32> to vector<8x384xf32>
    %45 = arith.addf %42, %44 : vector<8x384xf32>
    %c0_28 = arith.constant 0 : index
    %c0_29 = arith.constant 0 : index
    %46 = vector.load %arg9[%c0_28, %c0_29] : memref<128x384xbf16, #tpu.memory_space<vmem>>, vector<128x384xbf16>
    %cst_30 = arith.constant dense<0.000000e+00> : vector<8x384xf32>
    %47 = tpu.matmul %1, %46, %cst_30 {dimension_numbers = #tpu.dot_dimension_numbers<[1], [0], [0], [1], [0, 0, 1, 1], [], []>} : vector<8x128xbf16>, vector<128x384xbf16>, vector<8x384xf32> -> vector<8x384xf32>
    %c0_31 = arith.constant 0 : index
    %c0_32 = arith.constant 0 : index
    %48 = vector.load %arg11[%c0_31, %c0_32] : memref<1x384xf32, #tpu.memory_space<vmem>>, vector<1x384xf32>
    %49 = vector.broadcast %48 : vector<1x384xf32> to vector<8x384xf32>
    %50 = arith.addf %47, %49 : vector<8x384xf32>
    %51 = vector.extract_strided_slice %45 {offsets = [0, 0], sizes = [8, 128], strides = [1, 1]} : vector<8x384xf32> to vector<8x128xf32>
    %52 = vector.extract_strided_slice %50 {offsets = [0, 0], sizes = [8, 128], strides = [1, 1]} : vector<8x384xf32> to vector<8x128xf32>
    %53 = arith.addf %51, %52 : vector<8x128xf32>
    %54 = arith.negf %53 : vector<8x128xf32>
    %55 = math.exp %54 : vector<8x128xf32>
    %cst_33 = arith.constant 1.000000e+00 : f32
    %56 = vector.broadcast %cst_33 : f32 to vector<8x128xf32>
    %57 = arith.addf %56, %55 : vector<8x128xf32>
    %58 = arith.divf %56, %57 : vector<8x128xf32>
    %59 = vector.extract_strided_slice %45 {offsets = [0, 128], sizes = [8, 128], strides = [1, 1]} : vector<8x384xf32> to vector<8x128xf32>
    %60 = vector.extract_strided_slice %50 {offsets = [0, 128], sizes = [8, 128], strides = [1, 1]} : vector<8x384xf32> to vector<8x128xf32>
    %61 = arith.addf %59, %60 : vector<8x128xf32>
    %62 = arith.negf %61 : vector<8x128xf32>
    %63 = math.exp %62 : vector<8x128xf32>
    %cst_34 = arith.constant 1.000000e+00 : f32
    %64 = vector.broadcast %cst_34 : f32 to vector<8x128xf32>
    %65 = arith.addf %64, %63 : vector<8x128xf32>
    %66 = arith.divf %64, %65 : vector<8x128xf32>
    %67 = vector.extract_strided_slice %45 {offsets = [0, 256], sizes = [8, 128], strides = [1, 1]} : vector<8x384xf32> to vector<8x128xf32>
    %68 = vector.extract_strided_slice %50 {offsets = [0, 256], sizes = [8, 128], strides = [1, 1]} : vector<8x384xf32> to vector<8x128xf32>
    %69 = arith.mulf %58, %68 : vector<8x128xf32>
    %70 = arith.addf %67, %69 : vector<8x128xf32>
    %71 = math.tanh %70 : vector<8x128xf32>
    %cst_35 = arith.constant 1.000000e+00 : f32
    %72 = vector.broadcast %cst_35 : f32 to vector<8x128xf32>
    %73 = arith.subf %72, %66 : vector<8x128xf32>
    %74 = arith.mulf %73, %71 : vector<8x128xf32>
    %75 = arith.mulf %66, %0 : vector<8x128xf32>
    %76 = arith.addf %74, %75 : vector<8x128xf32>
    %c0_36 = arith.constant 0 : index
    %c0_37 = arith.constant 0 : index
    %77 = vector.load %arg13[%c0_36, %c0_37] : memref<8x128xf32, #tpu.memory_space<vmem>>, vector<8x128xf32>
    tpu.vector_store %arg13[%c0_36, %c0_37], %76 {strides = array<i32>} : memref<8x128xf32, #tpu.memory_space<vmem>>, vector<8x128xf32>,
    %c0_38 = arith.constant 0 : index
    %c0_39 = arith.constant 0 : index
    %78 = vector.load %arg14[%c0_38, %c0_39] : memref<8x8xf32, #tpu.memory_space<vmem>>, vector<8x8xf32>
    tpu.vector_store %arg14[%c0_38, %c0_39], %29 {strides = array<i32>} : memref<8x8xf32, #tpu.memory_space<vmem>>, vector<8x8xf32>,
    return
  }
}

</mosaic_0001>

<bundles_post_ra>
// kernel: decoder_forward.3
= control target key start
LH: loop header
LB: loop body
LE: loop exit
PB: predicated region body
PF: predicated region fallthrough
CT: control target
= control target key end

     0   :  { %7 = vsyncpa [#allocation3], 0  ;;  %s275_s9 = smov [#allocation2]   ;;  %s353_s0 = inlined_call_operand.vmem [shape: f32[64,128], index: 0, kind: input, shape index: {}]   ;;  %s354_s1 = inlined_call_operand.hbm [shape: bf16[128,128], index: 1, kind: input, shape index: {}]   ;;  %s355_s2 = inlined_call_operand.vmem [shape: f32[64,128], index: 2, kind: output, shape index: {}]  }
   0x1   :  { %s15_s10 = sshll.u32 %s275_s9, 4  ;;  %s251_s13 = scalar_lea.hbm %s354_s1, 1024  ;;  %s16_s10 = int_to_ptr.vmem [resolvable:$true] %s15_s10 }
   0x2   :  { %p252_p0 = scmp.ne.s32.totalorder %s354_s1, %s251_s13  ;;  %p255_p1 = scmp.lt.u32.totalorder %s251_s13, %s354_s1 }
   0x4   :  { %p257_p2 = pnand %p255_p1, %p252_p0 }
   0x6   :  { %260 = shalt.err (!%p257_p2)
}
   0x7   :  { %s261_s18 = scalar_lea.vmem %s16_s10, 1024  ;;  %p266_p4 = scmp.lt.s32.totalorder %s16_s10, %s16_s10 }
   0x8   :  { %p262_p3 = scmp.ne.s32.totalorder %s16_s10, %s261_s18  ;;  %p267_p5 = scmp.lt.s32.totalorder %s261_s18, %s261_s18 }
   0xa   :  { %p268_p6 = por %p267_p5, %p266_p4 }
   0xc   :  { %p269_p7 = pnand %p268_p6, %p262_p3 }
   0xe   :  { %272 = shalt.err (!%p269_p7)
}
   0xf   :  { %s276_s19 = smov 64   ;;  %s277_s20 = smov 4  }
  0x10   :  { %21 = dma.hbm_to_vmem [thread:$0]  %s354_s1, 1024, %s16_s10, [#allocation3], %s276_s19, %s276_s19, %s277_s20  }
  0x11   :  { %273 = dma.done.wait [#allocation3], 1024  }
  0x12   :  { %274 = vsyncadd [#allocation3], 4294966272  ;;  %v243_v0 = vld [vmem:[#allocation2] sm:$0xff]   ;;  %v244_v1 = vld [vmem:[#allocation2 + $0x8] sm:$0xff]  }
  0x13   :  { %200 = vmatprep.subr.bf16.mxu0 %v243_v0  ;;  %224 = vmatprep.subr.bf16.mxu1 %v243_v0  ;;  %v245_v2 = vld [vmem:[#allocation2 + $0x10] sm:$0xff]   ;;  %v246_v3 = vld [vmem:[#allocation2 + $0x18] sm:$0xff]   ;;  %v26_v4 = vld [vmem:[%s353_s0] sm:$0xff] }
  0x14   :  { %201 = vmatpush3.bf16.msra.mxu0 %v243_v0  ;;  %232 = vmatpush3.bf16.msra.mxu1 %v243_v0  ;;  %v27_v5 = vld [vmem:[%s353_s0 + $0x8] sm:$0xff]  ;;  %v30_v6 = vld [vmem:[%s353_s0 + $0x20] sm:$0xff]  ;;  %v249_v12 = vld [vmem:[#allocation2 + $0x30] sm:$0xff]  }
  0x15   :  { %202 = vmatprep.subr.bf16.mxu0 %v244_v1  ;;  %225 = vmatprep.subr.bf16.mxu1 %v244_v1  ;;  %v34_v7 = vpack.c.bf16 %v27_v5, %v26_v4  ;;  %v31_v8 = vld [vmem:[%s353_s0 + $0x28] sm:$0xff]  ;;  %v247_v10 = vld [vmem:[#allocation2 + $0x20] sm:$0xff]   ;;  %v250_v13 = vld [vmem:[#allocation2 + $0x38] sm:$0xff]  }
  0x16   :  { %v36_v9 = vpack.c.bf16 %v31_v8, %v30_v6  ;;  %v248_v11 = vld [vmem:[#allocation2 + $0x28] sm:$0xff]   ;;  %v28_v14 = vld [vmem:[%s353_s0 + $0x10] sm:$0xff]  ;;  %v29_v15 = vld [vmem:[%s353_s0 + $0x18] sm:$0xff] }
  0x17   :  { %216 = vmatprep.mubr.bf16.mxu0 %v34_v7  ;;  %v32_v16 = vld [vmem:[%s353_s0 + $0x30] sm:$0xff]  ;;  %v33_v17 = vld [vmem:[%s353_s0 + $0x38] sm:$0xff]  ;;  %v35_v18 = vpack.c.bf16 %v29_v15, %v28_v14 }
  0x18   :  { %203 = vmatpush3.bf16.msra.mxu0 %v244_v1  ;;  %233 = vmatpush3.bf16.msra.mxu1 %v244_v1  ;;  %v37_v19 = vpack.c.bf16 %v33_v17, %v32_v16 }
  0x19   :  { %204 = vmatprep.subr.bf16.mxu0 %v245_v2  ;;  %226 = vmatprep.subr.bf16.mxu1 %v245_v2 }
  0x1a   :  { %220 = vmatprep.mubr.bf16.mxu1 %v36_v9 }
  0x1c   :  { %205 = vmatpush3.bf16.msra.mxu0 %v245_v2  ;;  %234 = vmatpush3.bf16.msra.mxu1 %v245_v2 }
  0x1d   :  { %206 = vmatprep.subr.bf16.mxu0 %v246_v3  ;;  %227 = vmatprep.subr.bf16.mxu1 %v246_v3 }
  0x20   :  { %207 = vmatpush3.bf16.msra.mxu0 %v246_v3  ;;  %235 = vmatpush3.bf16.msra.mxu1 %v246_v3 }
  0x21   :  { %208 = vmatprep.subr.bf16.mxu0 %v247_v10  ;;  %228 = vmatprep.subr.bf16.mxu1 %v247_v10 }
  0x24   :  { %209 = vmatpush3.bf16.msra.mxu0 %v247_v10  ;;  %236 = vmatpush3.bf16.msra.mxu1 %v247_v10 }
  0x25   :  { %210 = vmatprep.subr.bf16.mxu0 %v248_v11  ;;  %229 = vmatprep.subr.bf16.mxu1 %v248_v11 }
  0x28   :  { %211 = vmatpush3.bf16.msra.mxu0 %v248_v11  ;;  %237 = vmatpush3.bf16.msra.mxu1 %v248_v11 }
  0x29   :  { %212 = vmatprep.subr.bf16.mxu0 %v249_v12  ;;  %230 = vmatprep.subr.bf16.mxu1 %v249_v12 }
  0x2c   :  { %213 = vmatpush3.bf16.msra.mxu0 %v249_v12  ;;  %238 = vmatpush3.bf16.msra.mxu1 %v249_v12 }
  0x2d   :  { %214 = vmatprep.subr.bf16.mxu0 %v250_v13  ;;  %231 = vmatprep.subr.bf16.mxu1 %v250_v13 }
  0x30   :  { %215 = vmatpush3.bf16.msra.mxu0 %v250_v13  ;;  %239 = vmatpush3.bf16.msra.mxu1 %v250_v13 }
  0x33   :  { %217 = vmatmul.mubr.bf16.vlgmr.msra.gmra.mrb[0].mxu0 %v35_v18  ;;  %221 = vmatmul.mubr.bf16.vlgmr.msra.gmra.mrb[0].mxu1 %v37_v19 }
 0x106   :  { %v218_v20 = vpop.f32.mrb[0].mxu0  ;;  %v222_v21 = vpop.f32.mrb[0].mxu1 }
 0x107   :  { %169 = vst [vmem:[%s355_s2 + $0x10] sm:$0xff] %v218_v20  ;;  %173 = vst [vmem:[%s355_s2 + $0x30] sm:$0xff] %v222_v21  ;;  %v136_v22 = vpop.f32.mrb[1].mxu0  ;;  %v152_v23 = vpop.f32.mrb[1].mxu1 }
 0x108   :  { %167 = vst [vmem:[%s355_s2] sm:$0xff] %v136_v22  ;;  %171 = vst [vmem:[%s355_s2 + $0x20] sm:$0xff] %v152_v23  ;;  %v219_v24 = vpop.f32.mrb[2].mxu0  ;;  %v223_v25 = vpop.f32.mrb[2].mxu1 }
 0x109   :  { %170 = vst [vmem:[%s355_s2 + $0x18] sm:$0xff] %v219_v24  ;;  %174 = vst [vmem:[%s355_s2 + $0x38] sm:$0xff] %v223_v25  ;;  %v139_v26 = vpop.f32.mrb[3].mxu0  ;;  %v155_v27 = vpop.f32.mrb[3].mxu1 }
 0x10a   :  { %168 = vst [vmem:[%s355_s2 + $0x8] sm:$0xff] %v139_v26  ;;  %172 = vst [vmem:[%s355_s2 + $0x28] sm:$0xff] %v155_v27 }
 0x10b   :  { %179 = vsyncpa [#allocation3], 1 }

// kernel: decoder_forward.5
= control target key start
LH: loop header
LB: loop body
LE: loop exit
PB: predicated region body
PF: predicated region fallthrough
CT: control target
= control target key end

     0   :  { %8 = vsyncpa [#allocation4], 0  ;;  %s843_s0 = inlined_call_operand.vmem [shape: f32[8,128], index: 0, kind: input, shape index: {}]   ;;  %s844_s1 = inlined_call_operand.vmem [shape: bf16[128,1024], index: 1, kind: input, shape index: {}]   ;;  %s845_s2 = inlined_call_operand.vmem [shape: f32[1,1024], index: 2, kind: input, shape index: {}]   ;;  %s846_s3 = inlined_call_operand.hbm [shape: f32[8,1024], index: 3, kind: output, shape index: {}]  }
   0x1   :  { %10 = vsyncpa [#allocation4 + $0x1], 0  ;;  %s711_s12 = smov 0   ;;  %s713_s13 = smov 0  }
   0x2   :  { %s715_s14 = smov 0   ;;  %s717_s15 = smov 0  }
   0x3 LB: > { %s732_s16 = sadd.s32 4294967295, %s687_s15   ;;  %s528_s17 = sadd.s32 4294967294, %s687_s15   ;;  %s687_s15 = sphi %s717_s15, %s852_s15   ;;  %s683_s14 = sphi %s715_s14, %s851_s14   ;;  %s679_s13 = sphi %s713_s13, %s850_s13   ;;  %s675_s12 = sphi %s711_s12, %s849_s12  }
   0x4   : > { %s736_s18 = sadd.s32 1, %s687_s15   ;;  %s44_s19 = sadd.s32 1, %s683_s14 }
   0x5   : > { %s41_s20 = ssub.s32 %s687_s15, %s736_s18  ;;  %p51_p0 = scmp.ne.s32.totalorder %s683_s14, %s679_s13 }
   0x6   : > { %p42_p1 = scmp.eq.s32.totalorder %s41_s20, 0  ;;  %p52_p2 = scmp.eq.s32.totalorder %s687_s15, 0 }
   0x7   : > { %p107_p3 = scmp.eq.s32.totalorder %s732_s16, 3  ;;  %p112_p4 = scmp.ne.s32.totalorder %s679_s13, %s675_s12 }
   0x8   : > { %s748_s21 = scalar_select %p42_p1, %s683_s14, %s44_s19  }
   0x9   : > { %p53_p5 = por %p52_p2, %p51_p0  ;;  %p750_p6 = por %p107_p3, %p51_p0 }
   0xa   : > { %p113_p7 = scmp.eq.s32.totalorder %s528_s17, 3  ;;  %p530_p9 = scmp.ge.s32.totalorder %s687_s15, 4 }
   0xc   : > { %p754_p8 = por %p113_p7, %p112_p4  ;;  %132 = sbr.rel (%p530_p9) target bundleno = 39 (0x27), region = 20 }
  0x13   : > { %135 = sbr.rel (!%p53_p5) target bundleno = 39 (0x27), region = 24  ;;  %s137_s24 = sand.u32 (%p53_p5), 1, %s683_s14  }
  0x14   : > { %s559_s25 = sshll.u32 (%p53_p5), %s687_s15, 3  ;;  %s531_s26 = sshll.u32 (%p53_p5), %s137_s24, 7 }
  0x15   : > { %s764_s29 = scalar_lea.vmem (%p53_p5), %s844_s1, %s559_s25  ;;  %s139_s30 = scalar_lea.vmem (%p53_p5), [#allocation2], %s531_s26 }
  0x16   : > { %v200_v0 = vld [vmem:[%s764_s29] sm:$0xff] (%p53_p5) }
  0x17   : > { %v202_v1 = vld [vmem:[%s764_s29 + $0x20] sm:$0xff] (%p53_p5)  ;;  %201 = vst [vmem:[%s139_s30] sm:$0xff] (%p53_p5), %v200_v0 }
  0x18   : > { %v204_v2 = vld [vmem:[%s764_s29 + $0x40] sm:$0xff] (%p53_p5)  ;;  %203 = vst [vmem:[%s139_s30 + $0x8] sm:$0xff] (%p53_p5), %v202_v1 }
  0x19   : > { %205 = vst [vmem:[%s139_s30 + $0x10] sm:$0xff] (%p53_p5), %v204_v2  ;;  %v206_v3 = vld [vmem:[%s764_s29 + $0x60] sm:$0xff] (%p53_p5) }
  0x1a   : > { %v208_v4 = vld [vmem:[%s764_s29 + $0x80] sm:$0xff]  ;;  %207 = vst [vmem:[%s139_s30 + $0x18] sm:$0xff] %v206_v3 }
  0x1b   : > { %v210_v5 = vld [vmem:[%s764_s29 + $0xa0] sm:$0xff]  ;;  %209 = vst [vmem:[%s139_s30 + $0x20] sm:$0xff] %v208_v4 }
  0x1c   : > { %211 = vst [vmem:[%s139_s30 + $0x28] sm:$0xff] %v210_v5  ;;  %v212_v6 = vld [vmem:[%s764_s29 + $0xc0] sm:$0xff] }
  0x1d   : > { %v214_v7 = vld [vmem:[%s764_s29 + $0xe0] sm:$0xff]  ;;  %213 = vst [vmem:[%s139_s30 + $0x30] sm:$0xff] %v212_v6 }
  0x1e   : > { %v216_v8 = vld [vmem:[%s764_s29 + $0x100] sm:$0xff]  ;;  %215 = vst [vmem:[%s139_s30 + $0x38] sm:$0xff] %v214_v7 }
  0x1f   : > { %217 = vst [vmem:[%s139_s30 + $0x40] sm:$0xff] %v216_v8  ;;  %v218_v9 = vld [vmem:[%s764_s29 + $0x120] sm:$0xff] }
  0x20   : > { %v220_v10 = vld [vmem:[%s764_s29 + $0x140] sm:$0xff]  ;;  %219 = vst [vmem:[%s139_s30 + $0x48] sm:$0xff] %v218_v9 }
  0x21   : > { %v222_v11 = vld [vmem:[%s764_s29 + $0x160] sm:$0xff]  ;;  %221 = vst [vmem:[%s139_s30 + $0x50] sm:$0xff] %v220_v10 }
  0x22   : > { %223 = vst [vmem:[%s139_s30 + $0x58] sm:$0xff] %v222_v11  ;;  %v224_v12 = vld [vmem:[%s764_s29 + $0x180] sm:$0xff] }
  0x23   : > { %v226_v13 = vld [vmem:[%s764_s29 + $0x1a0] sm:$0xff]  ;;  %225 = vst [vmem:[%s139_s30 + $0x60] sm:$0xff] %v224_v12 }
  0x24   : > { %v228_v14 = vld [vmem:[%s764_s29 + $0x1c0] sm:$0xff]  ;;  %227 = vst [vmem:[%s139_s30 + $0x68] sm:$0xff] %v226_v13 }
  0x25   : > { %229 = vst [vmem:[%s139_s30 + $0x70] sm:$0xff] %v228_v14  ;;  %v230_v15 = vld [vmem:[%s764_s29 + $0x1e0] sm:$0xff] }
  0x26   : > { %231 = vst [vmem:[%s139_s30 + $0x78] sm:$0xff] %v230_v15 }
  0x27 PF: > { %p534_p10 = scmp.ge.s32.totalorder %s687_s15, 1  ;;  %p244_p11 = scmp.lt.s32.totalorder %s687_s15, 5 }
  0x29   : > { %p245_p12 = pnand %p534_p10, %p244_p11 }
  0x2a   : > { %s785_s4 = sand.u32 (!%p245_p12), 1, %s679_s13   ;;  %v689_v16 = vmov (!%p245_p12), 0   ;;  %v286_v33 = vld [vmem:[%s843_s0] sm:$0xff] (!%p245_p12)  ;;  %s537_s9 = sshll.u32 (!%p245_p12), %s732_s16, 1  ;;  %v306_v35 = vlaneseq (!%p245_p12) }
  0x2b   : > { %248 = sbr.rel (%p245_p12) target bundleno = 307 (0x133), region = 66  ;;  %s535_s5 = sshll.u32 (!%p245_p12), %s785_s4, 7  ;;  %428 = vmatprep.mubr.bf16.mxu0 (!%p245_p12), %v689_v16  ;;  %v287_v34 = vpack.c.bf16 (!%p245_p12), %v286_v33, %v286_v33 }
  0x2c   : > { %s253_s6 = scalar_lea.vmem (!%p245_p12), [#allocation2], %s535_s5  ;;  %p280_p13 = scmp.lt.s32.totalorder (!%p245_p12), %s537_s9, 7  ;;  %v307_v36 = vshrl.u32 (!%p245_p12), %v306_v35, 7 }
  0x2d   : > { %v601_v17 = vld [vmem:[%s253_s6 + $0x4] ss:$8 sps:$4 sm:$0xff] (!%p245_p12)   ;;  %v603_v18 = vld [vmem:[%s253_s6] ss:$8 sps:$4 sm:$0xff] (!%p245_p12)   ;;  %v604_v19 = vld [vmem:[%s253_s6 + $0x14] ss:$8 sps:$4 sm:$0xff] (!%p245_p12)  }
  0x2e   : > { %396 = vmatprep.subr.bf16.mxu0 (!%p245_p12), %v601_v17  ;;  %v606_v20 = vld [vmem:[%s253_s6 + $0x10] ss:$8 sps:$4 sm:$0xff] (!%p245_p12)   ;;  %v607_v21 = vld [vmem:[%s253_s6 + $0x24] ss:$8 sps:$4 sm:$0xff] (!%p245_p12)   ;;  %v609_v22 = vld [vmem:[%s253_s6 + $0x20] ss:$8 sps:$4 sm:$0xff] (!%p245_p12)  }
  0x2f   : > { %397 = vmatpush1.bf16.msra.mxu0 (!%p245_p12), %v603_v18  ;;  %v610_v23 = vld [vmem:[%s253_s6 + $0x34] ss:$8 sps:$4 sm:$0xff] (!%p245_p12)   ;;  %v612_v24 = vld [vmem:[%s253_s6 + $0x30] ss:$8 sps:$4 sm:$0xff] (!%p245_p12)   ;;  %v613_v25 = vld [vmem:[%s253_s6 + $0x44] ss:$8 sps:$4 sm:$0xff] (!%p245_p12)  }
  0x30   : > { %398 = vmatprep.subr.bf16.mxu0 (!%p245_p12), %v604_v19  ;;  %v615_v26 = vld [vmem:[%s253_s6 + $0x40] ss:$8 sps:$4 sm:$0xff] (!%p245_p12)   ;;  %v616_v27 = vld [vmem:[%s253_s6 + $0x54] ss:$8 sps:$4 sm:$0xff] (!%p245_p12)   ;;  %v618_v28 = vld [vmem:[%s253_s6 + $0x50] ss:$8 sps:$4 sm:$0xff] (!%p245_p12)  }
  0x31   : > { %v619_v29 = vld [vmem:[%s253_s6 + $0x64] ss:$8 sps:$4 sm:$0xff] (!%p245_p12)   ;;  %v621_v30 = vld [vmem:[%s253_s6 + $0x60] ss:$8 sps:$4 sm:$0xff] (!%p245_p12)   ;;  %v622_v31 = vld [vmem:[%s253_s6 + $0x74] ss:$8 sps:$4 sm:$0xff] (!%p245_p12)  }
  0x32   : > { %v624_v32 = vld [vmem:[%s253_s6 + $0x70] ss:$8 sps:$4 sm:$0xff]   ;;  %s854_s9 = smov (!%p280_p13, %s537_s9), 7  ;;  %s536_s19 = sshll.u32 %s785_s4, 4  ;;  %v308_v37 = vsub.s32 0, %v307_v36  ;;  %v312_v39 = vsub.s32 1, %v307_v36 }
  0x33   : > { %399 = vmatpush1.bf16.msra.mxu0 %v606_v20  ;;  %s282_s17 = scalar_lea.vmem %s845_s2, %s854_s9  ;;  %s560_s20 = sshll.u32 %s732_s16, 8 }
  0x34   : > { %400 = vmatprep.subr.bf16.mxu0 %v607_v21  ;;  %v304_v38 = vld [vmem:[%s282_s17] sm:$0x3]  ;;  %s277_s24 = scalar_lea.vmem [#allocation3], %s536_s19  ;;  %s800_s28 = scalar_lea.hbm %s846_s3, %s560_s20 }
  0x35   : > { %v309_v40 = vrot.slane %v304_v38, %v308_v37  ;;  %v313_v41 = vrot.slane %v304_v38, %v312_v39  ;;  %s454_s25 = sshll.u32 %s277_s24, 4  ;;  %s440_s16 = scalar_lea.sflag [#allocation4], %s785_s4  ;;  %s802_s25 = int_to_ptr.vmem [resolvable:$true] %s454_s25 }
  0x36   : > { %s625_s29 = scalar_lea.vmem %s802_s25, 256  ;;  %s690_s30 = smov [#allocation3]  }
  0x37   : > { %401 = vmatpush1.bf16.msra.mxu0 %v609_v22  ;;  %p626_p0 = scmp.ne.s32.totalorder %s802_s25, %s625_s29  ;;  %s629_s5 = sshll.u32 %s690_s30, 4  ;;  %s630_s5 = int_to_ptr.vmem [resolvable:$false] %s629_s5 }
  0x38   : > { %402 = vmatprep.subr.bf16.mxu0 %v610_v23  ;;  %s631_s6 = scalar_lea.vmem %s630_s5, 512  ;;  %p632_p3 = scmp.lt.s32.totalorder %s802_s25, %s630_s5 }
  0x39   : > { %p627_p1 = pnand %p626_p0, %p750_p6  ;;  %p633_p4 = scmp.lt.s32.totalorder %s631_s6, %s625_s29 }
  0x3b   : > { %403 = vmatpush1.bf16.msra.mxu0 %v612_v24  ;;  %p628_p2 = pneg %p627_p1  ;;  %p634_p5 = por %p633_p4, %p632_p3 }
  0x3c   : > { %404 = vmatprep.subr.bf16.mxu0 %v613_v25 }
  0x3d   : > { %p635_p7 = pnand %p634_p5, %p628_p2 }
  0x3f   : > { %405 = vmatpush1.bf16.msra.mxu0 %v615_v26 }
  0x40   : > { %406 = vmatprep.subr.bf16.mxu0 %v616_v27 }
  0x43   : > { %407 = vmatpush1.bf16.msra.mxu0 %v618_v28 }
  0x44   : > { %408 = vmatprep.subr.bf16.mxu0 %v619_v29 }
  0x47   : > { %409 = vmatpush1.bf16.msra.mxu0 %v621_v30 }
  0x48   : > { %410 = vmatprep.subr.bf16.mxu0 %v622_v31 }
  0x4b   : > { %411 = vmatpush1.bf16.msra.mxu0 %v624_v32 }
  0x4e   : > { %429 = vmatmul.mubr.bf16.vlgmr.msra.gmra.mrb[0].mxu0 %v287_v34 }
 0x121   : > { %v430_v42 = vpop.f32.mrb[0].mxu0 }
 0x122   : > { %v431_v43 = vadd.f32 %v430_v42, %v309_v40  ;;  %v432_v44 = vpop.f32.mrb[1].mxu0 }
 0x123   : > { %v433_v45 = vadd.f32 %v432_v44, %v313_v41  ;;  %v434_v46 = vpop.f32.mrb[2].mxu0 }
 0x124   : > { %437 = vst [vmem:[%s277_s24] sm:$0xff] %v431_v43  ;;  %v435_v47 = vpop.f32.mrb[3].mxu0 }
 0x125   : > { %438 = vst [vmem:[%s277_s24 + $0x8] sm:$0xff] %v433_v45 }
 0x126   : > { %638 = shalt.err (!%p635_p7)
}
 0x127   : > { %s639_s4 = scalar_lea.hbm %s800_s28, 256  ;;  %s643_s9 = scalar_lea.hbm %s846_s3, 1024 }
 0x128   : > { %p640_p9 = scmp.ne.s32.totalorder %s800_s28, %s639_s4  ;;  %p644_p12 = scmp.lt.u32.totalorder %s800_s28, %s846_s3 }
 0x129   : > { %p645_p13 = scmp.lt.u32.totalorder %s643_s9, %s639_s4  ;;  %p647_p1 = scmp.lt.u32.totalorder %s639_s4, %s800_s28 }
 0x12a   : > { %p641_p10 = pnand %p640_p9, %p750_p6 }
 0x12b   : > { %p646_p0 = por %p645_p13, %p644_p12 }
 0x12c   : > { %p642_p11 = pneg %p641_p10 }
 0x12d   : > { %p648_p2 = por %p647_p1, %p646_p0 }
 0x12f   : > { %p649_p3 = pnand %p648_p2, %p642_p11 }
 0x131   : > { %652 = shalt.err (!%p649_p3)
}
 0x132   : > { %561 = dma.vmem_to_hbm [thread:$0]  (%p750_p6), %s802_s25, 256, %s800_s28, %s440_s16  }
 0x133 PF: > { %p567_p4 = scmp.ge.s32.totalorder %s687_s15, 2  ;;  %s466_s17 = sand.u32 1, %s675_s12  }
 0x134   : > { %s467_s19 = scalar_lea.sflag [#allocation4], %s466_s17 }
 0x135   : > { %p564_p5 = pnand %p567_p4, %p754_p8 }
 0x137   : > { %670 = dma.done.wait (!%p564_p5), %s467_s19, 256  }
 0x138   : > { %672 = vsyncadd (!%p564_p5), %s467_s19, 4294967040  ;;  %p13_p7 = scmp.ge.s32.totalorder %s736_s18, 6   ;;  %s849_s12 = smov %s679_s13 }
 0x139   : > { %s850_s13 = smov %s683_s14  ;;  %s851_s14 = smov %s748_s21 }
 0x13a   : > { %s852_s15 = smov %s736_s18  ;;  %15 = sbr.rel (!%p13_p7) target bundleno = 3 (0x3), region = 113 }
 0x141   :  { %472 = vsyncpa [#allocation4], 1 }
 0x142   :  { %474 = vsyncpa [#allocation4 + $0x1], 1 }

// kernel: decoder_forward.4
= control target key start
LH: loop header
LB: loop body
LE: loop exit
PB: predicated region body
PF: predicated region fallthrough
CT: control target
= control target key end

     0   :  { %21 = vsyncpa [#allocation4], 0  ;;  %s2547_s0 = inlined_call_operand.vmem [shape: f32[8,128], index: 0, kind: input, shape index: {}, may-alias: {0,13}]   ;;  %s2548_s1 = inlined_call_operand.vmem [shape: f32[8,8,128], index: 1, kind: input, shape index: {}]   ;;  %s2549_s2 = inlined_call_operand.vmem [shape: f32[8,8,128], index: 2, kind: input, shape index: {}]   ;;  %s2550_s3 = inlined_call_operand.vmem [shape: f32[8,128], index: 3, kind: input, shape index: {}]   ;;  %s2551_s4 = inlined_call_operand.hbm [shape: bf16[128,128], index: 4, kind: input, shape index: {}]   ;;  %s2552_s5 = inlined_call_operand.vmem [shape: f32[1,128], index: 5, kind: input, shape index: {}]   ;;  %s2553_s6 = inlined_call_operand.vmem [shape: f32[1,128], index: 6, kind: input, shape index: {}]   ;;  %s2554_s7 = inlined_call_operand.vmem [shape: bf16[128,384], index: 7, kind: input, shape index: {}]   ;;  %s2555_s8 = inlined_call_operand.hbm [shape: bf16[128,384], index: 8, kind: input, shape index: {}]   ;;  %s2556_s9 = inlined_call_operand.hbm [shape: bf16[128,384], index: 9, kind: input, shape index: {}]   ;;  %s2557_s10 = inlined_call_operand.vmem [shape: f32[1,384], index: 10, kind: input, shape index: {}]   ;;  %s2558_s11 = inlined_call_operand.vmem [shape: f32[1,384], index: 11, kind: input, shape index: {}]   ;;  %s2559_s12 = inlined_call_operand.<no memory space> [shape: f32[1], index: 12, kind: input, shape index: {}]   ;;  %s2560_s13 = inlined_call_operand.vmem [shape: f32[8,128], index: 13, kind: output, shape index: {0}, may-alias: {0,13}]   ;;  %s2561_s14 = inlined_call_operand.hbm [shape: f32[8,8], index: 14, kind: output, shape index: {1}]  }
   0x1   :  { %22 = vsyncpa [#allocation7], 0 }
   0x2   :  { %23 = vsyncpa [#allocation5], 0  ;;  %s2060_s29 = smov [#allocation6]   ;;  %s1966_s17 = scalar_lea.hbm %s2555_s8, 3072 }
   0x3   :  { %s55_s30 = sshll.u32 %s2060_s29, 4  ;;  %p1967_p0 = scmp.ne.s32.totalorder %s2555_s8, %s1966_s17  ;;  %s56_s30 = int_to_ptr.vmem [resolvable:$true] %s55_s30 }
   0x4   :  { %p1970_p1 = scmp.lt.u32.totalorder %s1966_s17, %s2555_s8 }
   0x6   :  { %p1972_p2 = pnand %p1970_p1, %p1967_p0 }
   0x8   :  { %1975 = shalt.err (!%p1972_p2)
}
   0x9   :  { %s1976_s22 = scalar_lea.vmem %s56_s30, 3072  ;;  %p1981_p4 = scmp.lt.s32.totalorder %s56_s30, %s56_s30 }
   0xa   :  { %p1977_p3 = scmp.ne.s32.totalorder %s56_s30, %s1976_s22  ;;  %p1982_p5 = scmp.lt.s32.totalorder %s1976_s22, %s1976_s22 }
   0xc   :  { %p1983_p6 = por %p1982_p5, %p1981_p4 }
   0xe   :  { %p1984_p7 = pnand %p1983_p6, %p1977_p3 }
  0x10   :  { %1987 = shalt.err (!%p1984_p7)
}
  0x11   :  { %s2061_s23 = smov 192   ;;  %s2062_s24 = smov 12  }
  0x12   :  { %61 = dma.hbm_to_vmem [thread:$0]  %s2555_s8, 3072, %s56_s30, [#allocation7], %s2061_s23, %s2061_s23, %s2062_s24  }
  0x13   :  { %s2063_s27 = smov [#allocation3]   ;;  %s1988_s16 = scalar_lea.hbm %s2551_s4, 1024 }
  0x14   :  { %s37_s28 = sshll.u32 %s2063_s27, 4  ;;  %p1989_p8 = scmp.ne.s32.totalorder %s2551_s4, %s1988_s16  ;;  %s38_s28 = int_to_ptr.vmem [resolvable:$true] %s37_s28 }
  0x15   :  { %p1992_p9 = scmp.lt.u32.totalorder %s1988_s16, %s2551_s4 }
  0x17   :  { %p1994_p10 = pnand %p1992_p9, %p1989_p8 }
  0x19   :  { %1997 = shalt.err (!%p1994_p10)
}
  0x1a   :  { %s1998_s21 = scalar_lea.vmem %s38_s28, 1024  ;;  %p2003_p12 = scmp.lt.s32.totalorder %s38_s28, %s38_s28 }
  0x1b   :  { %p1999_p11 = scmp.ne.s32.totalorder %s38_s28, %s1998_s21  ;;  %p2004_p13 = scmp.lt.s32.totalorder %s1998_s21, %s1998_s21 }
  0x1d   :  { %p2005_p0 = por %p2004_p13, %p2003_p12 }
  0x1f   :  { %p2006_p1 = pnand %p2005_p0, %p1999_p11 }
  0x21   :  { %2009 = shalt.err (!%p2006_p1)
}
  0x22   :  { %s2064_s8 = smov 64   ;;  %s2065_s30 = smov 4  }
  0x23   :  { %43 = dma.hbm_to_vmem [thread:$0]  %s2551_s4, 1024, %s38_s28, [#allocation4], %s2064_s8, %s2064_s8, %s2065_s30  }
  0x24   :  { %s2066_s26 = smov [#allocation8]   ;;  %s2010_s16 = scalar_lea.hbm %s2556_s9, 3072 }
  0x25   :  { %s67_s27 = sshll.u32 %s2066_s26, 4  ;;  %p2011_p2 = scmp.ne.s32.totalorder %s2556_s9, %s2010_s16  ;;  %s68_s27 = int_to_ptr.vmem [resolvable:$true] %s67_s27 }
  0x26   :  { %p2014_p3 = scmp.lt.u32.totalorder %s2010_s16, %s2556_s9 }
  0x28   :  { %p2016_p4 = pnand %p2014_p3, %p2011_p2 }
  0x2a   :  { %2019 = shalt.err (!%p2016_p4)
}
  0x2b   :  { %s2020_s21 = scalar_lea.vmem %s68_s27, 3072  ;;  %p2025_p6 = scmp.lt.s32.totalorder %s68_s27, %s68_s27 }
  0x2c   :  { %p2021_p5 = scmp.ne.s32.totalorder %s68_s27, %s2020_s21  ;;  %p2026_p7 = scmp.lt.s32.totalorder %s2020_s21, %s2020_s21 }
  0x2e   :  { %p2027_p8 = por %p2026_p7, %p2025_p6 }
  0x30   :  { %p2028_p9 = pnand %p2027_p8, %p2021_p5 }
  0x32   :  { %2031 = shalt.err (!%p2028_p9)
}
  0x33   :  { %73 = dma.hbm_to_vmem [thread:$0]  %s2556_s9, 3072, %s68_s27, [#allocation7], %s2061_s23, %s2061_s23, %s2062_s24  }
  0x34   :  { %2054 = dma.done.wait [#allocation4], 1024  }
  0x35   :  { %2055 = vsyncadd [#allocation4], 4294966272 }
  0x36   :  { %2056 = dma.done.wait [#allocation7], 6144  }
  0x37   :  { %2057 = vsyncadd [#allocation7], 4294961152  ;;  %v2067_v0 = vmov 0.0   ;;  %vm2068_vm0 = vmmov 0   ;;  %v1817_v1 = vld [vmem:[#allocation3] sm:$0xff]   ;;  %v1818_v2 = vld [vmem:[#allocation3 + $0x8] sm:$0xff]   ;;  %v208_v13 = vlaneseq }
  0x38   :  { %1711 = vmatprep.subr.bf16.mxu0 %v2067_v0  ;;  %1727 = vmatprep.mubr.msk.bf16.mxu0 %vm2068_vm0, %v2067_v0  ;;  %v1819_v3 = vld [vmem:[#allocation3 + $0x10] sm:$0xff]   ;;  %v1820_v4 = vld [vmem:[#allocation3 + $0x18] sm:$0xff]   ;;  %v1821_v5 = vld [vmem:[#allocation3 + $0x20] sm:$0xff]   ;;  %v2069_v11 = vmov 1966171168   ;;  %vm400_vm1 = vcmask 1041409  }
  0x39   :  { %1712 = vmatpush3.bf16.msra.mxu0 %v1817_v1  ;;  %v1822_v6 = vld [vmem:[#allocation3 + $0x28] sm:$0xff]   ;;  %v1823_v7 = vld [vmem:[#allocation3 + $0x30] sm:$0xff]   ;;  %v1824_v8 = vld [vmem:[#allocation3 + $0x38] sm:$0xff]   ;;  %v206_v12 = vunpack.c.l.s4 %v2069_v11  ;;  %v2209_v15 = vshrl.u32 %v208_v13, 7  ;;  %vm402_vm2 = vcmask 1042434   ;;  %vm404_vm3 = vcmask 1043459  }
  0x3a   :  { %1713 = vmatprep.subr.bf16.mxu0 %v2067_v0  ;;  %v90_v9 = vld [vmem:[%s2547_s0] sm:$0xff]  ;;  %v254_v37 = vld [vmem:[%s2548_s1 + $0x8] sm:$0xff]  ;;  %v255_v38 = vld [vmem:[%s2548_s1 + $0x10] sm:$0xff]  ;;  %vm406_vm4 = vcmask 1044484   ;;  %vm408_vm5 = vcmask 1045509   ;;  %vm410_vm6 = vcmask 1046534  }
  0x3b   :  { %v2202_v10 = vpack.c.bf16 %v90_v9, %v90_v9  ;;  %v207_v14 = vunpack.c.0.s8 %v206_v12  ;;  %v1591_v16 = vld [vmem:[%s2552_s5] ss:$0 sm:$0xff]  ;;  %v2216_v25 = vsub.s32 0, %v2209_v15  ;;  %v256_v45 = vld [vmem:[%s2548_s1 + $0x18] sm:$0xff]  ;;  %v258_v52 = vld [vmem:[%s2548_s1 + $0x28] sm:$0xff]  ;;  %vm412_vm7 = vcmask 1047559  }
  0x3c   :  { %v253_v33 = vld [vmem:[%s2548_s1] sm:$0xff]  ;;  %v259_v55 = vld [vmem:[%s2548_s1 + $0x30] sm:$0xff]  ;;  %v260_v59 = vld [vmem:[%s2548_s1 + $0x38] sm:$0xff]  ;;  %vm415_vm8 = vcmask 64512  }
  0x3d   :  { %1714 = vmatpush3.bf16.msra.mxu0 %v1818_v2  ;;  %v210_v17 = vsub.s32 %v207_v14, %v2209_v15  ;;  %v257_v41 = vld [vmem:[%s2548_s1 + $0x20] sm:$0xff] }
  0x3e   :  { %1715 = vmatprep.subr.bf16.mxu0 %v2067_v0  ;;  %v1600_v60 = vld [vmem:[%s2553_s6] ss:$0 sm:$0xff] }
  0x41   :  { %1716 = vmatpush3.bf16.msra.mxu0 %v1819_v3 }
  0x42   :  { %1717 = vmatprep.subr.bf16.mxu0 %v2067_v0 }
  0x45   :  { %1718 = vmatpush3.bf16.msra.mxu0 %v1820_v4 }
  0x46   :  { %1719 = vmatprep.subr.bf16.mxu0 %v2067_v0 }
  0x49   :  { %1720 = vmatpush3.bf16.msra.mxu0 %v1821_v5 }
  0x4a   :  { %1721 = vmatprep.subr.bf16.mxu0 %v2067_v0 }
  0x4d   :  { %1722 = vmatpush3.bf16.msra.mxu0 %v1822_v6 }
  0x4e   :  { %1723 = vmatprep.subr.bf16.mxu0 %v2067_v0 }
  0x51   :  { %1724 = vmatpush3.bf16.msra.mxu0 %v1823_v7 }
  0x52   :  { %1725 = vmatprep.subr.bf16.mxu0 %v2067_v0 }
  0x55   :  { %1726 = vmatpush3.bf16.msra.mxu0 %v1824_v8 }
  0x56   :  { %1731 = vmatprep.subr.bf16.mxu0 %v2067_v0 }
  0x58   :  { %1728 = vmatmul.mubr.bf16.vlgmr.msra.gmra.mrb[0].mxu0 %v2202_v10 }
  0x59   :  { %1747 = vmatprep.mubr.msk.bf16.mxu0 %vm2068_vm0, %v2067_v0 }
 0x12b   :  { %v197_v18 = vpop.f32.mrb[0].mxu0 }
 0x12c   :  { %v198_v19 = vadd.f32 %v1591_v16, %v197_v18  ;;  %v1729_v20 = vpop.f32.mrb[1].mxu0  ;;  %v367_v18 = vand.u32 127, %v208_v13 }
 0x12d   :  { %v200_v21 = vpop.f32.mrb[2].mxu0 }
 0x12e   :  { %v204_v22 = vcombine.high %v198_v19, %v198_v19  ;;  %v211_v23 = vrot.slane %v198_v19, %v210_v17  ;;  %v1730_v24 = vpop.f32.mrb[3].mxu0  ;;  %v349_v19 = vstv %s2559_s12  ;;  %v2258_v21 = vsub.s32 %v367_v18, %v2209_v15 }
 0x130   :  { %v218_v26 = vrot.slane %v204_v22, %v210_v17  ;;  %v219_v27 = vcombine.high %v211_v23, %v211_v23  ;;  %v227_v28 = vrot.slane %v211_v23, %v210_v17 }
 0x132   :  { %v220_v29 = vcombine.high %v218_v26, %v218_v26  ;;  %v234_v30 = vrot.slane %v218_v26, %v210_v17  ;;  %v241_v31 = vrot.slane %v219_v27, %v210_v17  ;;  %v249_v32 = vcombine.high %v227_v28, %v227_v28 }
 0x133   :  { %v264_v34 = vrot.slane %v227_v28, %v2216_v25 }
 0x134   :  { %v248_v35 = vrot.slane %v220_v29, %v210_v17  ;;  %v251_v36 = vcombine.high %v241_v31, %v241_v31  ;;  %v268_v39 = vrot.slane %v241_v31, %v2216_v25  ;;  %v250_v40 = vcombine.high %v234_v30, %v234_v30 }
 0x135   :  { %v272_v42 = vrot.slane %v249_v32, %v2216_v25  ;;  %v280_v43 = vrot.slane %v234_v30, %v2216_v25  ;;  %v301_v44 = vadd.f32 %v264_v34, %v253_v33 }
 0x136   :  { %v276_v46 = vrot.slane %v251_v36, %v2216_v25  ;;  %v302_v47 = vadd.f32 %v268_v39, %v254_v37  ;;  %v284_v49 = vrot.slane %v248_v35, %v2216_v25  ;;  %v252_v51 = vcombine.high %v248_v35, %v248_v35 }
 0x137   :  { %v303_v48 = vadd.f32 %v272_v42, %v255_v38  ;;  %1921 = vtanh.f32 %v301_v44  ;;  %v305_v50 = vadd.f32 %v280_v43, %v257_v41  ;;  %v288_v53 = vrot.slane %v250_v40, %v2216_v25 }
 0x138   :  { %v304_v54 = vadd.f32 %v276_v46, %v256_v45  ;;  %1923 = vtanh.f32 %v302_v47  ;;  %v306_v56 = vadd.f32 %v284_v49, %v258_v52  ;;  %v292_v57 = vrot.slane %v252_v51, %v2216_v25 }
 0x139   :  { %1925 = vtanh.f32 %v303_v48  ;;  %v307_v58 = vadd.f32 %v288_v53, %v259_v55  ;;  %v2070_v53 = vmov 0   ;;  %v2283_v55 = vsub.s32 2, %v2209_v15 }
 0x13a   :  { %1927 = vtanh.f32 %v305_v50  ;;  %v308_v62 = vadd.f32 %v292_v57, %v260_v59  ;;  %1816 = vset.pattern.permute.xlu0 %v2070_v53  ;;  %1815 = vset.pattern.permute.xlu1 %v2070_v53 }
 0x13b   :  { %1929 = vtanh.f32 %v304_v54  ;;  %947 = vmatprep.mubr.bf16.mxu1 %v2070_v53  ;;  %v2280_v54 = vsub.s32 1, %v2209_v15 }
 0x13c   :  { %1931 = vtanh.f32 %v306_v56  ;;  %v434_v56 = vsub.s32 3, %v2209_v15 }
 0x13d   :  { %1933 = vtanh.f32 %v307_v58 }
 0x13e   :  { %1935 = vtanh.f32 %v308_v62 }
 0x141   :  { %v1922_v61 = vpop.eup %1921 }
 0x142   :  { %v324_v63 = vmul.f32 %v1922_v61, %v1600_v60  ;;  %v1924_v1 = vpop.eup %1923  ;;  %v438_v61 = vsub.s32 4, %v2209_v15 }
 0x143   :  { %v1926_v2 = vpop.eup %1925  ;;  %v325_v5 = vmul.f32 %v1924_v1, %v1600_v60 }
 0x144   :  { %332 = vadd.xlane.f32.xlu0 %v324_v63  ;;  %v1928_v3 = vpop.eup %1927  ;;  %v326_v4 = vmul.f32 %v1926_v2, %v1600_v60 }
 0x145   :  { %v1930_v6 = vpop.eup %1929  ;;  %v328_v9 = vmul.f32 %v1928_v3, %v1600_v60 }
 0x146   :  { %336 = vadd.xlane.f32.xlu1 %v326_v4  ;;  %v1932_v7 = vpop.eup %1931  ;;  %v327_v8 = vmul.f32 %v1930_v6, %v1600_v60 }
 0x147   :  { %v1934_v11 = vpop.eup %1933  ;;  %v329_v12 = vmul.f32 %v1932_v7, %v1600_v60 }
 0x148   :  { %334 = vadd.xlane.f32.xlu0 %v325_v5  ;;  %v330_v14 = vmul.f32 %v1934_v11, %v1600_v60  ;;  %v1936_v16 = vpop.eup %1935  ;;  %v442_v5 = vsub.s32 5, %v2209_v15 }
 0x149   :  { %v331_v17 = vmul.f32 %v1936_v16, %v1600_v60  ;;  %v450_v16 = vsub.s32 7, %v2209_v15 }
 0x14a   :  { %338 = vadd.xlane.f32.xlu1 %v327_v8 }
 0x14c   :  { %340 = vadd.xlane.f32.xlu0 %v328_v9  ;;  %v446_v9 = vsub.s32 6, %v2209_v15  ;;  %v1863_v15 = vld [vmem:[%s2554_s7 + $0x1c] ss:$12 sps:$4 sm:$0xff]  }
 0x14e   :  { %342 = vadd.xlane.f32.xlu1 %v329_v12 }
 0x150   :  { %344 = vadd.xlane.f32.xlu0 %v330_v14 }
 0x152   :  { %346 = vadd.xlane.f32.xlu1 %v331_v17 }
 0x1d1   :  { %v333_v20 = vpop.xlane.xlu0 %332 }
 0x1d2   :  { %v350_v22 = vadd.f32 %v349_v19, %v333_v20 }
 0x1d3   :  { %v337_v23 = vpop.xlane.xlu1 %336 }
 0x1d4   :  { %v352_v26 = vadd.f32 %v349_v19, %v337_v23  ;;  %v371_v28 = vrot.slane %v350_v22, %v2258_v21 }
 0x1d5   :  { %v335_v24 = vpop.xlane.xlu0 %334 }
 0x1d6   :  { %v351_v27 = vadd.f32 %v349_v19, %v335_v24  ;;  %v379_v13 = vrot.slane %v352_v26, %v2258_v21 }
 0x1d7   :  { %v339_v30 = vpop.xlane.xlu1 %338 }
 0x1d8   :  { %v375_v29 = vrot.slane %v351_v27, %v2258_v21  ;;  %v353_v33 = vadd.f32 %v349_v19, %v339_v30 }
 0x1d9   :  { %v341_v31 = vpop.xlane.xlu0 %340 }
 0x1da   :  { %v401_v32 = vsel %vm400_vm1, %v375_v29, %v371_v28  ;;  %v354_v34 = vadd.f32 %v349_v19, %v341_v31  ;;  %v383_v36 = vrot.slane %v353_v33, %v2258_v21 }
 0x1db   :  { %v403_v35 = vsel %vm402_vm2, %v379_v13, %v401_v32  ;;  %v343_v38 = vpop.xlane.xlu1 %342 }
 0x1dc   :  { %v387_v37 = vrot.slane %v354_v34, %v2258_v21  ;;  %v405_v40 = vsel %vm404_vm3, %v383_v36, %v403_v35  ;;  %v355_v41 = vadd.f32 %v349_v19, %v343_v38 }
 0x1dd   :  { %v345_v39 = vpop.xlane.xlu0 %344 }
 0x1de   :  { %v356_v42 = vadd.f32 %v349_v19, %v345_v39  ;;  %v407_v43 = vsel %vm406_vm4, %v387_v37, %v405_v40  ;;  %v391_v44 = vrot.slane %v355_v41, %v2258_v21 }
 0x1df   :  { %v347_v46 = vpop.xlane.xlu1 %346 }
 0x1e0   :  { %v395_v45 = vrot.slane %v356_v42, %v2258_v21  ;;  %v357_v47 = vadd.f32 %v349_v19, %v347_v46  ;;  %v409_v48 = vsel %vm408_vm5, %v391_v44, %v407_v43 }
 0x1e2   :  { %v411_v49 = vsel %vm410_vm6, %v395_v45, %v409_v48  ;;  %v399_v50 = vrot.slane %v357_v47, %v2258_v21 }
 0x1e4   :  { %v413_v51 = vsel %vm412_vm7, %v399_v50, %v411_v49 }
 0x1e5   :  { %v416_v52 = vsel %vm415_vm8, %v413_v51, -inf }
 0x1e6   :  { %417 = vmax.xlane.f32.xlu0 %v416_v52 }
 0x273   :  { %v418_v57 = vpop.xlane.xlu0 %417 }
 0x274   :  { %v423_v58 = vrot.slane %v418_v57, %v2216_v25  ;;  %v427_v59 = vrot.slane %v418_v57, %v2280_v54  ;;  %v431_v60 = vrot.slane %v418_v57, %v2283_v55  ;;  %v435_v62 = vrot.slane %v418_v57, %v434_v56 }
 0x275   :  { %v439_v6 = vrot.slane %v418_v57, %v438_v61  ;;  %v443_v11 = vrot.slane %v418_v57, %v442_v5  ;;  %v447_v17 = vrot.slane %v418_v57, %v446_v9  ;;  %v451_v23 = vrot.slane %v418_v57, %v450_v16 }
 0x276   :  { %v460_v63 = vsub.f32 %v350_v22, %v423_v58  ;;  %v461_v1 = vsub.f32 %v351_v27, %v427_v59  ;;  %v462_v2 = vsub.f32 %v352_v26, %v431_v60  ;;  %v463_v7 = vsub.f32 %v353_v33, %v435_v62 }
 0x277   :  { %v464_v12 = vsub.f32 %v354_v34, %v439_v6  ;;  %v465_v18 = vsub.f32 %v355_v41, %v443_v11  ;;  %v466_v24 = vsub.f32 %v356_v42, %v447_v17  ;;  %v467_v28 = vsub.f32 %v357_v47, %v451_v23  ;;  %v1832_v6 = vld [vmem:[#allocation6 + $0x20] ss:$12 sps:$4 sm:$0xff]   ;;  %v1836_v11 = vld [vmem:[#allocation6 + $0x38] ss:$12 sps:$4 sm:$0xff]   ;;  %v1840_v17 = vld [vmem:[#allocation6 + $0x50] ss:$12 sps:$4 sm:$0xff]  }
 0x278   :  { %v468_v3 = vmul.f32 1.442695, %v460_v63  ;;  %v470_v4 = vmul.f32 1.442695, %v461_v1  ;;  %v472_v8 = vmul.f32 1.442695, %v462_v2 }
 0x279   :  { %v474_v14 = vmul.f32 1.442695, %v463_v7  ;;  %v476_v19 = vmul.f32 1.442695, %v464_v12  ;;  %v478_v26 = vmul.f32 1.442695, %v465_v18 }
 0x27a   :  { %1937 = vpow2.f32 %v468_v3  ;;  %v480_v29 = vmul.f32 1.442695, %v466_v24  ;;  %v482_v30 = vmul.f32 1.442695, %v467_v28  ;;  %v1825_v1 = vld [vmem:[#allocation6 + $0x4] ss:$12 sps:$4 sm:$0xff]  }
 0x27b   :  { %1939 = vpow2.f32 %v470_v4  ;;  %v1827_v2 = vld [vmem:[#allocation6] ss:$12 sps:$4 sm:$0xff]   ;;  %v1828_v3 = vld [vmem:[#allocation6 + $0x8] ss:$12 sps:$4 sm:$0xff]   ;;  %915 = vmatprep.subr.bf16.mxu1 %v1825_v1  ;;  %v1831_v7 = vld [vmem:[#allocation6 + $0x18] ss:$12 sps:$4 sm:$0xff]  }
 0x27c   :  { %1941 = vpow2.f32 %v472_v8  ;;  %v1829_v4 = vld [vmem:[#allocation6 + $0x1c] ss:$12 sps:$4 sm:$0xff]   ;;  %1732 = vmatpush3.bf16.msra.mxu0 %v1828_v3  ;;  %916 = vmatpush1.bf16.msra.mxu1 %v1827_v2  ;;  %v1833_v8 = vld [vmem:[#allocation6 + $0x34] ss:$12 sps:$4 sm:$0xff]  }
 0x27d   :  { %1943 = vpow2.f32 %v474_v14  ;;  %1733 = vmatprep.subr.bf16.mxu0 %v2067_v0  ;;  %917 = vmatprep.subr.bf16.mxu1 %v1829_v4  ;;  %v1835_v12 = vld [vmem:[#allocation6 + $0x30] ss:$12 sps:$4 sm:$0xff]   ;;  %v1837_v14 = vld [vmem:[#allocation6 + $0x4c] ss:$12 sps:$4 sm:$0xff]   ;;  %v1839_v18 = vld [vmem:[#allocation6 + $0x48] ss:$12 sps:$4 sm:$0xff]  }
 0x27e   :  { %1945 = vpow2.f32 %v476_v19  ;;  %v1873_v1 = vld [vmem:[%s2554_s7 + $0x60] ss:$12 sps:$4 sm:$0xff]   ;;  %v1876_v2 = vld [vmem:[%s2554_s7 + $0x68] ss:$12 sps:$4 sm:$0xff]   ;;  %v1877_v4 = vld [vmem:[%s2554_s7 + $0x78] ss:$12 sps:$4 sm:$0xff]  }
 0x27f   :  { %1947 = vpow2.f32 %v478_v26  ;;  %v1879_v3 = vld [vmem:[%s2554_s7 + $0x7c] ss:$12 sps:$4 sm:$0xff]  }
 0x280   :  { %1949 = vpow2.f32 %v480_v29  ;;  %1734 = vmatpush3.bf16.msra.mxu0 %v1832_v6  ;;  %918 = vmatpush1.bf16.msra.mxu1 %v1831_v7  ;;  %v1880_v6 = vld [vmem:[%s2554_s7 + $0x80] ss:$12 sps:$4 sm:$0xff]  }
 0x281   :  { %1951 = vpow2.f32 %v482_v30  ;;  %1735 = vmatprep.subr.bf16.mxu0 %v2067_v0  ;;  %919 = vmatprep.subr.bf16.mxu1 %v1833_v8  ;;  %v1883_v7 = vld [vmem:[%s2554_s7 + $0x94] ss:$12 sps:$4 sm:$0xff]   ;;  %v1881_v8 = vld [vmem:[%s2554_s7 + $0x90] ss:$12 sps:$4 sm:$0xff]  }
 0x284   :  { %v2301_v20 = vpop.eup %1937  ;;  %1736 = vmatpush3.bf16.msra.mxu0 %v1836_v11  ;;  %920 = vmatpush1.bf16.msra.mxu1 %v1835_v12  ;;  %v1884_v11 = vld [vmem:[%s2554_s7 + $0x98] ss:$12 sps:$4 sm:$0xff]  }
 0x285   :  { %v2303_v22 = vpop.eup %1939  ;;  %493 = vperm.xlu1 %1815, %v2301_v20   ;;  %1737 = vmatprep.subr.bf16.mxu0 %v2067_v0  ;;  %v1887_v12 = vld [vmem:[%s2554_s7 + $0xac] ss:$12 sps:$4 sm:$0xff]  }
 0x286   :  { %496 = vperm.xlu0 %1816, %v2303_v22   ;;  %v2309_v27 = vpop.eup %1941  ;;  %921 = vmatprep.subr.bf16.mxu1 %v1837_v14  ;;  %v1885_v14 = vld [vmem:[%s2554_s7 + $0xa8] ss:$12 sps:$4 sm:$0xff]  }
 0x287   :  { %v2312_v13 = vpop.eup %1943 }
 0x288   :  { %v2315_v31 = vpop.eup %1945  ;;  %1738 = vmatpush3.bf16.msra.mxu0 %v1840_v17  ;;  %922 = vmatpush1.bf16.msra.mxu1 %v1839_v18  ;;  %v1888_v17 = vld [vmem:[%s2554_s7 + $0xb0] ss:$12 sps:$4 sm:$0xff]  }
 0x289   :  { %499 = vperm.xlu1 %1815, %v2309_v27   ;;  %v2318_v32 = vpop.eup %1947  ;;  %1739 = vmatprep.subr.bf16.mxu0 %v2067_v0  ;;  %v1891_v18 = vld [vmem:[#allocation8 + $0x4] ss:$12 sps:$4 sm:$0xff]  }
 0x28a   :  { %v2321_v33 = vpop.eup %1949 }
 0x28b   :  { %v2324_v34 = vpop.eup %1951 }
 0x28d   :  { %502 = vperm.xlu1 %1815, %v2312_v13  }
 0x291   :  { %505 = vperm.xlu1 %1815, %v2315_v31  }
 0x295   :  { %508 = vperm.xlu1 %1815, %v2318_v32  }
 0x299   :  { %511 = vperm.xlu1 %1815, %v2321_v33  }
 0x29d   :  { %514 = vperm.xlu1 %1815, %v2324_v34  }
 0x304   :  { %v494_v35 = vpop.permute.xlu1 %493 }
 0x305   :  { %v497_v39 = vpop.permute.xlu0 %496  ;;  %v519_v42 = vrot.slane %v494_v35, %v2258_v21  ;;  %v1841_v35 = vld [vmem:[#allocation6 + $0x64] ss:$12 sps:$4 sm:$0xff]  }
 0x306   :  { %v523_v41 = vrot.slane %v497_v39, %v2258_v21  ;;  %923 = vmatprep.subr.bf16.mxu1 %v1841_v35  ;;  %v1844_v39 = vld [vmem:[#allocation6 + $0x68] ss:$12 sps:$4 sm:$0xff]  }
 0x307   :  { %1740 = vmatpush3.bf16.msra.mxu0 %v1844_v39  ;;  %v612_v39 = vld [vmem:[%s2549_s2 + $0x18] sm:$0xff] }
 0x308   :  { %v500_v36 = vpop.permute.xlu1 %499  ;;  %v548_v47 = vsel %vm400_vm1, %v523_v41, %v519_v42  ;;  %v1847_v41 = vld [vmem:[#allocation6 + $0x78] ss:$12 sps:$4 sm:$0xff]   ;;  %1741 = vmatprep.subr.bf16.mxu0 %v2067_v0 }
 0x309   :  { %v527_v43 = vrot.slane %v500_v36, %v2258_v21 }
 0x30b   :  { %v549_v49 = vsel %vm402_vm2, %v527_v43, %v548_v47  ;;  %v1855_v47 = vld [vmem:[#allocation6 + $0xa8] ss:$12 sps:$4 sm:$0xff]  }
 0x30c   :  { %v503_v37 = vpop.permute.xlu1 %502 }
 0x30d   :  { %v531_v44 = vrot.slane %v503_v37, %v2258_v21 }
 0x30f   :  { %v550_v51 = vsel %vm404_vm3, %v531_v44, %v549_v49  ;;  %v1851_v44 = vld [vmem:[#allocation6 + $0x90] ss:$12 sps:$4 sm:$0xff]   ;;  %v1857_v49 = vld [vmem:[%s2554_s7] ss:$12 sps:$4 sm:$0xff]  }
 0x310   :  { %v506_v38 = vpop.permute.xlu1 %505 }
 0x311   :  { %v535_v45 = vrot.slane %v506_v38, %v2258_v21  ;;  %v1843_v38 = vld [vmem:[#allocation6 + $0x60] ss:$12 sps:$4 sm:$0xff]  }
 0x312   :  { %924 = vmatpush1.bf16.msra.mxu1 %v1843_v38 }
 0x313   :  { %v551_v52 = vsel %vm406_vm4, %v535_v45, %v550_v51  ;;  %v1860_v51 = vld [vmem:[%s2554_s7 + $0x8] ss:$12 sps:$4 sm:$0xff]  }
 0x314   :  { %v509_v40 = vpop.permute.xlu1 %508 }
 0x315   :  { %v539_v48 = vrot.slane %v509_v40, %v2258_v21 }
 0x317   :  { %v552_v58 = vsel %vm408_vm5, %v539_v48, %v551_v52  ;;  %v721_v48 = vld [vmem:[%s2550_s3] sm:$0xff] }
 0x318   :  { %v512_v46 = vpop.permute.xlu1 %511  ;;  %v1864_v52 = vld [vmem:[%s2554_s7 + $0x20] ss:$12 sps:$4 sm:$0xff]  }
 0x319   :  { %v543_v50 = vrot.slane %v512_v46, %v2258_v21 }
 0x31b   :  { %v553_v60 = vsel %vm410_vm6, %v543_v50, %v552_v58  ;;  %v722_v50 = vpack.c.bf16 %v721_v48, %v721_v48  ;;  %v1868_v58 = vld [vmem:[%s2554_s7 + $0x38] ss:$12 sps:$4 sm:$0xff]  }
 0x31c   :  { %v515_v57 = vpop.permute.xlu1 %514 }
 0x31d   :  { %v547_v59 = vrot.slane %v515_v57, %v2258_v21  ;;  %v1865_v57 = vld [vmem:[%s2554_s7 + $0x30] ss:$12 sps:$4 sm:$0xff]  }
 0x31f   :  { %v554_v62 = vsel %vm412_vm7, %v547_v59, %v553_v60  ;;  %v1871_v59 = vld [vmem:[%s2554_s7 + $0x4c] ss:$12 sps:$4 sm:$0xff]   ;;  %v1869_v60 = vld [vmem:[%s2554_s7 + $0x48] ss:$12 sps:$4 sm:$0xff]  }
 0x320   :  { %v556_v63 = vsel %vm415_vm8, %v554_v62, 0.0  ;;  %v1872_v62 = vld [vmem:[%s2554_s7 + $0x50] ss:$12 sps:$4 sm:$0xff]  }
 0x321   :  { %557 = vadd.xlane.f32.xlu1 %v556_v63  ;;  %v1875_v63 = vld [vmem:[%s2554_s7 + $0x64] ss:$12 sps:$4 sm:$0xff]  }
 0x3ae   :  { %v558_v19 = vpop.xlane.xlu1 %557 }
 0x3af   :  { %1953 = vrcp.f32 %v558_v19 }
 0x3b9   :  { %v1954_v23 = vpop.eup %1953 }
 0x3ba   :  { %v564_v24 = vrot.slane %v1954_v23, %v2216_v25  ;;  %v568_v28 = vrot.slane %v1954_v23, %v2280_v54  ;;  %v572_v30 = vrot.slane %v1954_v23, %v2283_v55  ;;  %v576_v37 = vrot.slane %v1954_v23, %v434_v56  ;;  %v1849_v56 = vld [vmem:[#allocation6 + $0x94] ss:$12 sps:$4 sm:$0xff]  }
 0x3bb   :  { %v584_v43 = vrot.slane %v1954_v23, %v442_v5  ;;  %v588_v46 = vrot.slane %v1954_v23, %v446_v9  ;;  %v1859_v5 = vld [vmem:[%s2554_s7 + $0x4] ss:$12 sps:$4 sm:$0xff]   ;;  %v592_v9 = vrot.slane %v1954_v23, %v450_v16 }
 0x3bc   :  { %v601_v26 = vmul.f32 %v2301_v20, %v564_v24  ;;  %v602_v29 = vmul.f32 %v2303_v22, %v568_v28  ;;  %v603_v36 = vmul.f32 %v2309_v27, %v572_v30  ;;  %v1845_v20 = vld [vmem:[#allocation6 + $0x7c] ss:$12 sps:$4 sm:$0xff]   ;;  %v604_v40 = vmul.f32 %v2312_v13, %v576_v37  ;;  %v1848_v27 = vld [vmem:[#allocation6 + $0x80] ss:$12 sps:$4 sm:$0xff]   ;;  %v1852_v13 = vld [vmem:[#allocation6 + $0x98] ss:$12 sps:$4 sm:$0xff]  }
 0x3bd   :  { %v580_v22 = vrot.slane %v1954_v23, %v438_v61  ;;  %925 = vmatprep.subr.bf16.mxu1 %v1845_v20  ;;  %1742 = vmatpush3.bf16.msra.mxu0 %v1848_v27  ;;  %v1853_v61 = vld [vmem:[#allocation6 + $0xac] ss:$12 sps:$4 sm:$0xff]   ;;  %v606_v45 = vmul.f32 %v2318_v32, %v584_v43  ;;  %v607_v32 = vmul.f32 %v2321_v33, %v588_v46  ;;  %v609_v23 = vld [vmem:[%s2549_s2] sm:$0xff]  ;;  %v611_v30 = vld [vmem:[%s2549_s2 + $0x10] sm:$0xff] }
 0x3be   :  { %619 = vperm.xlu0 %1816, %v601_v26   ;;  %926 = vmatpush1.bf16.msra.mxu1 %v1847_v41  ;;  %v608_v16 = vmul.f32 %v2324_v34, %v592_v9  ;;  %v1861_v33 = vld [vmem:[%s2554_s7 + $0x18] ss:$12 sps:$4 sm:$0xff]   ;;  %v1867_v34 = vld [vmem:[%s2554_s7 + $0x34] ss:$12 sps:$4 sm:$0xff]   ;;  %v610_v24 = vld [vmem:[%s2549_s2 + $0x8] sm:$0xff] }
 0x3bf   :  { %v605_v42 = vmul.f32 %v2315_v31, %v580_v22  ;;  %1743 = vmatprep.subr.bf16.mxu0 %v2067_v0  ;;  %927 = vmatprep.subr.bf16.mxu1 %v1849_v56  ;;  %v1856_v31 = vld [vmem:[#allocation6 + $0xb0] ss:$12 sps:$4 sm:$0xff]   ;;  %v613_v43 = vld [vmem:[%s2549_s2 + $0x20] sm:$0xff] }
 0x3c1   :  { %1744 = vmatpush3.bf16.msra.mxu0 %v1852_v13 }
 0x3c2   :  { %624 = vperm.xlu0 %1816, %v602_v29   ;;  %928 = vmatpush1.bf16.msra.mxu1 %v1851_v44 }
 0x3c3   :  { %1745 = vmatprep.subr.bf16.mxu0 %v2067_v0  ;;  %929 = vmatprep.subr.bf16.mxu1 %v1853_v61 }
 0x3c5   :  { %1746 = vmatpush3.bf16.msra.mxu0 %v1856_v31  ;;  %v614_v31 = vld [vmem:[%s2549_s2 + $0x28] sm:$0xff] }
 0x3c6   :  { %629 = vperm.xlu0 %1816, %v603_v36   ;;  %930 = vmatpush1.bf16.msra.mxu1 %v1855_v47 }
 0x3c7   :  { %1751 = vmatprep.subr.bf16.mxu0 %v2067_v0  ;;  %1149 = vmatprep.subr.bf16.mxu1 %v1859_v5 }
 0x3c8   :  { %1748 = vmatmul.mubr.bf16.vlgmr.msra.gmra.mrb[4].mxu0 %v722_v50 }
 0x3c9   :  { %948 = vmatmul.mubr.bf16.vlgmr.msra.gmra.mrb[0].mxu1 %v722_v50  ;;  %1752 = vmatpush3.bf16.msra.mxu0 %v1860_v51 }
 0x3ca   :  { %634 = vperm.xlu0 %1816, %v604_v40   ;;  %1150 = vmatpush1.bf16.msra.mxu1 %v1857_v49 }
 0x3cb   :  { %1181 = vmatprep.mubr.bf16.mxu1 %v2070_v53  ;;  %1151 = vmatprep.subr.bf16.mxu1 %v1863_v15 }
 0x3cc   :  { %1753 = vmatprep.subr.bf16.mxu0 %v2067_v0  ;;  %1767 = vmatprep.mubr.msk.bf16.mxu0 %vm2068_vm0, %v2067_v0 }
 0x3cd   :  { %1754 = vmatpush3.bf16.msra.mxu0 %v1864_v52  ;;  %v615_v52 = vld [vmem:[%s2549_s2 + $0x30] sm:$0xff] }
 0x3ce   :  { %639 = vperm.xlu0 %1816, %v605_v42   ;;  %1152 = vmatpush1.bf16.msra.mxu1 %v1861_v33 }
 0x3cf   :  { %1153 = vmatprep.subr.bf16.mxu1 %v1867_v34  ;;  %1755 = vmatprep.subr.bf16.mxu0 %v2067_v0 }
 0x3d1   :  { %1756 = vmatpush3.bf16.msra.mxu0 %v1868_v58 }
 0x3d2   :  { %644 = vperm.xlu0 %1816, %v606_v45   ;;  %1154 = vmatpush1.bf16.msra.mxu1 %v1865_v57 }
 0x3d3   :  { %1155 = vmatprep.subr.bf16.mxu1 %v1871_v59  ;;  %1757 = vmatprep.subr.bf16.mxu0 %v2067_v0 }
 0x3d5   :  { %1758 = vmatpush3.bf16.msra.mxu0 %v1872_v62 }
 0x3d6   :  { %649 = vperm.xlu0 %1816, %v607_v32   ;;  %1156 = vmatpush1.bf16.msra.mxu1 %v1869_v60 }
 0x3d7   :  { %1157 = vmatprep.subr.bf16.mxu1 %v1875_v63  ;;  %1759 = vmatprep.subr.bf16.mxu0 %v2067_v0 }
 0x3d9   :  { %1760 = vmatpush3.bf16.msra.mxu0 %v1876_v2 }
 0x3da   :  { %654 = vperm.xlu0 %1816, %v608_v16   ;;  %1158 = vmatpush1.bf16.msra.mxu1 %v1873_v1 }
 0x3db   :  { %1159 = vmatprep.subr.bf16.mxu1 %v1879_v3  ;;  %1761 = vmatprep.subr.bf16.mxu0 %v2067_v0 }
 0x3dd   :  { %1762 = vmatpush3.bf16.msra.mxu0 %v1880_v6 }
 0x3de   :  { %1160 = vmatpush1.bf16.msra.mxu1 %v1877_v4  ;;  %1763 = vmatprep.subr.bf16.mxu0 %v2067_v0 }
 0x3df   :  { %1161 = vmatprep.subr.bf16.mxu1 %v1883_v7 }
 0x3e1   :  { %1764 = vmatpush3.bf16.msra.mxu0 %v1884_v11 }
 0x3e2   :  { %1162 = vmatpush1.bf16.msra.mxu1 %v1881_v8  ;;  %1765 = vmatprep.subr.bf16.mxu0 %v2067_v0 }
 0x3e3   :  { %1163 = vmatprep.subr.bf16.mxu1 %v1887_v12 }
 0x3e5   :  { %1766 = vmatpush3.bf16.msra.mxu0 %v1888_v17 }
 0x3e6   :  { %1164 = vmatpush1.bf16.msra.mxu1 %v1885_v14  ;;  %1771 = vmatprep.subr.bf16.mxu0 %v2067_v0  ;;  %v616_v14 = vld [vmem:[%s2549_s2 + $0x38] sm:$0xff]  ;;  %s2071_s2 = smov [#allocation9]  }
 0x3e7   :  { %1427 = vmatprep.subr.bf16.mxu1 %v1891_v18  ;;  %s1579_s21 = sshll.u32 %s2071_s2, 4  ;;  %s1580_s21 = int_to_ptr.vmem [resolvable:$true] %s1579_s21 }
 0x3e8   :  { %s2032_s4 = scalar_lea.vmem %s1580_s21, 128  ;;  %p2037_p11 = scmp.lt.s32.totalorder %s1580_s21, %s1580_s21 }
 0x3e9   :  { %p2033_p10 = scmp.ne.s32.totalorder %s1580_s21, %s2032_s4  ;;  %p2038_p12 = scmp.lt.s32.totalorder %s2032_s4, %s2032_s4 }
 0x3eb   :  { %p2039_p13 = por %p2038_p12, %p2037_p11 }
 0x3ed   :  { %p2040_p0 = pnand %p2039_p13, %p2033_p10 }
 0x43d   :  { %v620_v19 = vpop.permute.xlu0 %619 }
 0x43e   :  { %v657_v26 = vmul.f32 %v620_v19, %v609_v23  ;;  %v1533_v34 = vrot.slane %v620_v19, %v2258_v21 }
 0x440   :  { %v665_v35 = vrot.slane %v657_v26, 4 }
 0x441   :  { %v625_v28 = vpop.permute.xlu0 %624 }
 0x442   :  { %v658_v29 = vmul.f32 %v625_v28, %v610_v24  ;;  %v666_v40 = vadd.f32 %v665_v35, %v657_v26  ;;  %v1537_v50 = vrot.slane %v625_v28, %v2258_v21 }
 0x444   :  { %v671_v36 = vrot.slane %v658_v29, 4  ;;  %v667_v44 = vrot.slane %v666_v40, 2  ;;  %v1562_v2 = vsel %vm400_vm1, %v1537_v50, %v1533_v34 }
 0x445   :  { %v630_v37 = vpop.permute.xlu0 %629 }
 0x446   :  { %v659_v38 = vmul.f32 %v630_v37, %v611_v30  ;;  %v672_v22 = vadd.f32 %v671_v36, %v658_v29  ;;  %v668_v48 = vadd.f32 %v667_v44, %v666_v40  ;;  %v1541_v57 = vrot.slane %v630_v37, %v2258_v21 }
 0x448   :  { %v677_v20 = vrot.slane %v659_v38, 4  ;;  %v673_v13 = vrot.slane %v672_v22, 2  ;;  %v669_v59 = vrot.slane %v668_v48, 1  ;;  %v1563_v17 = vsel %vm402_vm2, %v1541_v57, %v1562_v2 }
 0x449   :  { %v635_v41 = vpop.permute.xlu0 %634 }
 0x44a   :  { %v660_v27 = vmul.f32 %v635_v41, %v612_v39  ;;  %v678_v56 = vadd.f32 %v677_v20, %v659_v38  ;;  %v674_v32 = vadd.f32 %v673_v13, %v672_v22  ;;  %v1545_v62 = vrot.slane %v635_v41, %v2258_v21 }
 0x44b   :  { %v670_v24 = vadd.f32 %v669_v59, %v668_v48 }
 0x44c   :  { %v683_v42 = vrot.slane %v660_v27, 4  ;;  %v679_v46 = vrot.slane %v678_v56, 2  ;;  %v675_v60 = vrot.slane %v674_v32, 1  ;;  %v1564_v28 = vsel %vm404_vm3, %v1545_v62, %v1563_v17  ;;  %v1894_v17 = vld [vmem:[#allocation8 + $0x1c] ss:$12 sps:$4 sm:$0xff]  }
 0x44d   :  { %v640_v61 = vpop.permute.xlu0 %639 }
 0x44e   :  { %v684_v45 = vadd.f32 %v683_v42, %v660_v27  ;;  %v661_v47 = vmul.f32 %v640_v61, %v613_v43  ;;  %v680_v15 = vadd.f32 %v679_v46, %v678_v56  ;;  %v1549_v3 = vrot.slane %v640_v61, %v2258_v21 }
 0x44f   :  { %v676_v26 = vadd.f32 %v675_v60, %v674_v32 }
 0x450   :  { %v685_v5 = vrot.slane %v684_v45, 2  ;;  %v689_v9 = vrot.slane %v661_v47, 4  ;;  %v681_v7 = vrot.slane %v680_v15, 1  ;;  %v1565_v35 = vsel %vm406_vm4, %v1549_v3, %v1564_v28  ;;  %v1900_v28 = vld [vmem:[#allocation8 + $0x4c] ss:$12 sps:$4 sm:$0xff]  }
 0x451   :  { %v645_v49 = vpop.permute.xlu0 %644  ;;  %v714_v13 = vpack.c.bf16 %v676_v26, %v676_v26  ;;  %v1915_v26 = vld [vmem:[#allocation8 + $0x38] ss:$12 sps:$4 sm:$0xff]  }
 0x452   :  { %v662_v51 = vmul.f32 %v645_v49, %v614_v31  ;;  %v686_v16 = vadd.f32 %v685_v5, %v684_v45  ;;  %v690_v33 = vadd.f32 %v689_v9, %v661_v47  ;;  %v1553_v12 = vrot.slane %v645_v49, %v2258_v21 }
 0x453   :  { %v682_v39 = vadd.f32 %v681_v7, %v680_v15  ;;  %v713_v31 = vpack.c.bf16 %v670_v24, %v670_v24  ;;  %v1005_v9 = vunpack.c.l.b16 %v714_v13  ;;  %v1895_v24 = vld [vmem:[#allocation8 + $0x30] ss:$12 sps:$4 sm:$0xff]  }
 0x454   :  { %v695_v58 = vrot.slane %v662_v51, 4  ;;  %v691_v63 = vrot.slane %v690_v33, 2  ;;  %v687_v8 = vrot.slane %v686_v16, 1  ;;  %v1566_v40 = vsel %vm408_vm5, %v1553_v12, %v1565_v35  ;;  %v1910_v12 = vld [vmem:[#allocation8 + $0x8] ss:$12 sps:$4 sm:$0xff]  }
 0x455   :  { %v650_v1 = vpop.permute.xlu0 %649  ;;  %v715_v47 = vpack.c.bf16 %v682_v39, %v682_v39  ;;  %v1903_v35 = vld [vmem:[#allocation8 + $0x64] ss:$12 sps:$4 sm:$0xff]   ;;  %v1918_v39 = vld [vmem:[#allocation8 + $0x80] ss:$12 sps:$4 sm:$0xff]  }
 0x456   :  { %v696_v4 = vadd.f32 %v695_v58, %v662_v51  ;;  %v663_v6 = vmul.f32 %v650_v1, %v615_v52  ;;  %v692_v11 = vadd.f32 %v691_v63, %v690_v33  ;;  %v1557_v23 = vrot.slane %v650_v1, %v2258_v21 }
 0x457   :  { %v688_v20 = vadd.f32 %v687_v8, %v686_v16  ;;  %v1006_v15 = vunpack.c.l.b16 %v715_v47  ;;  %v1004_v16 = vunpack.c.l.b16 %v713_v31  ;;  %v1889_v8 = vld [vmem:[#allocation8] ss:$12 sps:$4 sm:$0xff]  }
 0x458   :  { %v697_v18 = vrot.slane %v696_v4, 2  ;;  %v701_v19 = vrot.slane %v663_v6, 4  ;;  %v693_v29 = vrot.slane %v692_v11, 1  ;;  %v1567_v42 = vsel %vm410_vm6, %v1557_v23, %v1566_v40  ;;  %v1897_v23 = vld [vmem:[#allocation8 + $0x34] ss:$12 sps:$4 sm:$0xff]  }
 0x459   :  { %v655_v30 = vpop.permute.xlu0 %654  ;;  %v716_v5 = vpack.c.bf16 %v688_v20, %v688_v20  ;;  %v1012_v58 = vsel %vm400_vm1, %v1005_v9, %v1004_v16  ;;  %v1909_v20 = vld [vmem:[#allocation8 + $0x94] ss:$12 sps:$4 sm:$0xff]   ;;  %v1907_v40 = vld [vmem:[#allocation8 + $0x90] ss:$12 sps:$4 sm:$0xff]  }
 0x45a   :  { %v698_v36 = vadd.f32 %v697_v18, %v696_v4  ;;  %v702_v37 = vadd.f32 %v701_v19, %v663_v6  ;;  %v664_v38 = vmul.f32 %v655_v30, %v616_v14  ;;  %v1561_v22 = vrot.slane %v655_v30, %v2258_v21  ;;  %v1892_v18 = vld [vmem:[#allocation8 + $0x18] ss:$12 sps:$4 sm:$0xff]   ;;  %v1914_v19 = vld [vmem:[#allocation8 + $0x20] ss:$12 sps:$4 sm:$0xff]   ;;  %v1916_v30 = vld [vmem:[#allocation8 + $0x50] ss:$12 sps:$4 sm:$0xff]  }
 0x45b   :  { %v694_v43 = vadd.f32 %v693_v29, %v692_v11  ;;  %v1007_v33 = vunpack.c.l.b16 %v716_v5  ;;  %v1013_v62 = vsel %vm402_vm2, %v1006_v15, %v1012_v58  ;;  %v1898_v29 = vld [vmem:[#allocation8 + $0x48] ss:$12 sps:$4 sm:$0xff]  }
 0x45c   :  { %v699_v41 = vrot.slane %v698_v36, 1  ;;  %v703_v27 = vrot.slane %v702_v37, 2  ;;  %v707_v56 = vrot.slane %v664_v38, 4  ;;  %v1568_v44 = vsel %vm412_vm7, %v1561_v22, %v1567_v42  ;;  %v1919_v22 = vld [vmem:[#allocation8 + $0x98] ss:$12 sps:$4 sm:$0xff]  }
 0x45d   :  { %1570 = vst.msk [vmem:[#allocation9] sm:$0xff] %vm415_vm8, %v1568_v44  ;;  %v717_v21 = vpack.c.bf16 %v694_v43, %v694_v43  ;;  %v1014_v1 = vsel %vm404_vm3, %v1007_v33, %v1013_v62 }
 0x45e   :  { %v700_v61 = vadd.f32 %v699_v41, %v698_v36  ;;  %v704_v45 = vadd.f32 %v703_v27, %v702_v37  ;;  %v708_v46 = vadd.f32 %v707_v56, %v664_v38  ;;  %v1917_v36 = vld [vmem:[#allocation8 + $0x68] ss:$12 sps:$4 sm:$0xff]   ;;  %v1904_v38 = vld [vmem:[#allocation8 + $0x78] ss:$12 sps:$4 sm:$0xff]   ;;  %v1920_v56 = vld [vmem:[#allocation8 + $0xb0] ss:$12 sps:$4 sm:$0xff]  }
 0x45f   :  { %v1008_v57 = vunpack.c.l.b16 %v717_v21  ;;  %v1906_v37 = vld [vmem:[#allocation8 + $0x7c] ss:$12 sps:$4 sm:$0xff]   ;;  %v1913_v41 = vld [vmem:[#allocation8 + $0xac] ss:$12 sps:$4 sm:$0xff]  }
 0x460   :  { %v705_v48 = vrot.slane %v704_v45, 1  ;;  %v709_v32 = vrot.slane %v708_v46, 2  ;;  %v718_v49 = vpack.c.bf16 %v700_v61, %v700_v61  ;;  %v1911_v27 = vld [vmem:[#allocation8 + $0xa8] ss:$12 sps:$4 sm:$0xff]  }
 0x461   :  { %v1015_v3 = vsel %vm406_vm4, %v1008_v57, %v1014_v1 }
 0x462   :  { %v706_v50 = vadd.f32 %v705_v48, %v704_v45  ;;  %v710_v51 = vadd.f32 %v709_v32, %v708_v46  ;;  %v1009_v59 = vunpack.c.l.b16 %v718_v49 }
 0x464   :  { %v719_v52 = vpack.c.bf16 %v706_v50, %v706_v50  ;;  %v711_v34 = vrot.slane %v710_v51, 1  ;;  %v1016_v6 = vsel %vm408_vm5, %v1009_v59, %v1015_v3 }
 0x466   :  { %v712_v60 = vadd.f32 %v711_v34, %v710_v51  ;;  %v1010_v63 = vunpack.c.l.b16 %v719_v52 }
 0x468   :  { %v720_v2 = vpack.c.bf16 %v712_v60, %v712_v60  ;;  %v1017_v7 = vsel %vm410_vm6, %v1010_v63, %v1016_v6 }
 0x46a   :  { %v1011_v4 = vunpack.c.l.b16 %v720_v2 }
 0x46c   :  { %v1018_v11 = vsel %vm412_vm7, %v1011_v4, %v1017_v7 }
 0x46d   :  { %v1019_v14 = vpack.c.b16 %v1018_v11, %v1018_v11 }
 0x46f   :  { %1182 = vmatmul.mubr.bf16.vlgmr.msra.gmra.mrb[0].mxu1 %v1019_v14  ;;  %1768 = vmatmul.mubr.bf16.vlgmr.msra.gmra.mrb[8].mxu0 %v1019_v14 }
 0x470   :  { %1428 = vmatpush1.bf16.msra.mxu1 %v1889_v8  ;;  %1772 = vmatpush3.bf16.msra.mxu0 %v1910_v12 }
 0x471   :  { %1429 = vmatprep.subr.bf16.mxu1 %v1894_v17  ;;  %1773 = vmatprep.subr.bf16.mxu0 %v2067_v0 }
 0x472   :  { %1459 = vmatprep.mubr.bf16.mxu1 %v2070_v53  ;;  %1787 = vmatprep.mubr.msk.bf16.mxu0 %vm2068_vm0, %v2067_v0  ;;  %v1901_v53 = vld [vmem:[#allocation8 + $0x60] ss:$12 sps:$4 sm:$0xff]  }
 0x474   :  { %1430 = vmatpush1.bf16.msra.mxu1 %v1892_v18  ;;  %1774 = vmatpush3.bf16.msra.mxu0 %v1914_v19 }
 0x475   :  { %1431 = vmatprep.subr.bf16.mxu1 %v1897_v23  ;;  %1775 = vmatprep.subr.bf16.mxu0 %v2067_v0 }
 0x478   :  { %1432 = vmatpush1.bf16.msra.mxu1 %v1895_v24  ;;  %1776 = vmatpush3.bf16.msra.mxu0 %v1915_v26 }
 0x479   :  { %1433 = vmatprep.subr.bf16.mxu1 %v1900_v28  ;;  %1777 = vmatprep.subr.bf16.mxu0 %v2067_v0 }
 0x47c   :  { %1434 = vmatpush1.bf16.msra.mxu1 %v1898_v29  ;;  %1778 = vmatpush3.bf16.msra.mxu0 %v1916_v30 }
 0x47d   :  { %1435 = vmatprep.subr.bf16.mxu1 %v1903_v35  ;;  %1779 = vmatprep.subr.bf16.mxu0 %v2067_v0 }
 0x480   :  { %1436 = vmatpush1.bf16.msra.mxu1 %v1901_v53  ;;  %1780 = vmatpush3.bf16.msra.mxu0 %v1917_v36 }
 0x481   :  { %1437 = vmatprep.subr.bf16.mxu1 %v1906_v37  ;;  %1781 = vmatprep.subr.bf16.mxu0 %v2067_v0 }
 0x484   :  { %1438 = vmatpush1.bf16.msra.mxu1 %v1904_v38  ;;  %1782 = vmatpush3.bf16.msra.mxu0 %v1918_v39 }
 0x485   :  { %1439 = vmatprep.subr.bf16.mxu1 %v1909_v20  ;;  %1783 = vmatprep.subr.bf16.mxu0 %v2067_v0 }
 0x488   :  { %1440 = vmatpush1.bf16.msra.mxu1 %v1907_v40  ;;  %1784 = vmatpush3.bf16.msra.mxu0 %v1919_v22 }
 0x489   :  { %1441 = vmatprep.subr.bf16.mxu1 %v1913_v41  ;;  %1785 = vmatprep.subr.bf16.mxu0 %v2067_v0 }
 0x48c   :  { %1442 = vmatpush1.bf16.msra.mxu1 %v1911_v27  ;;  %1786 = vmatpush3.bf16.msra.mxu0 %v1920_v56 }
 0x48f   :  { %1460 = vmatmul.mubr.bf16.vlgmr.msra.gmra.mrb[0].mxu1 %v2202_v10  ;;  %1788 = vmatmul.mubr.bf16.vlgmr.msra.gmra.mrb[12].mxu0 %v2202_v10 }
 0x49b   :  { %v990_v42 = vpop.f32.mrb[4].mxu0 }
 0x49c   :  { %v1749_v43 = vpop.f32.mrb[5].mxu0 }
 0x49d   :  { %v993_v44 = vpop.f32.mrb[6].mxu0 }
 0x49e   :  { %v1750_v13 = vpop.f32.mrb[7].mxu0 }
 0x49f   :  { %2043 = shalt.err (!%p2040_p0)
}
 0x4a0   :  { %s2044_s23 = scalar_lea.hbm %s2561_s14, 128 }
 0x4a1   :  { %p2045_p1 = scmp.ne.s32.totalorder %s2561_s14, %s2044_s23  ;;  %p2048_p2 = scmp.lt.u32.totalorder %s2044_s23, %s2561_s14 }
 0x4a3   :  { %p2050_p3 = pnand %p2048_p2, %p2045_p1 }
 0x4a5   :  { %2053 = shalt.err (!%p2050_p3)
}
 0x4a6   :  { %1582 = dma.vmem_to_hbm [thread:$0]  %s1580_s21, 128, %s2561_s14, [#allocation5]   ;;  %v1282_v47 = vld [vmem:[%s2558_s11] sm:$0x7] }
 0x4a7   :  { %v1230_v31 = vld [vmem:[%s2557_s10] sm:$0x7]  ;;  %v1287_v48 = vrot.slane %v1282_v47, %v2216_v25  ;;  %v1291_v21 = vrot.slane %v1282_v47, %v2280_v54 }
 0x4a8   :  { %v1235_v5 = vrot.slane %v1230_v31, %v2216_v25  ;;  %v1239_v32 = vrot.slane %v1230_v31, %v2280_v54  ;;  %v1295_v54 = vrot.slane %v1282_v47, %v2283_v55  ;;  %v1243_v2 = vrot.slane %v1230_v31, %v2283_v55  ;;  %v1965_v18 = vld [vmem:[%s2547_s0] sm:$0xff] }
 0x4aa   :  { %v1791_v9 = vadd.f32 %v1287_v48, %v1235_v5  ;;  %v1793_v50 = vadd.f32 %v1291_v21, %v1239_v32 }
 0x542   :  { %v1224_v0 = vpop.f32.mrb[8].mxu0 }
 0x543   :  { %v1225_v10 = vadd.f32 %v1224_v0, %v990_v42  ;;  %v1769_v61 = vpop.f32.mrb[9].mxu0 }
 0x544   :  { %v1227_v45 = vpop.f32.mrb[10].mxu0 }
 0x545   :  { %v1770_v46 = vpop.f32.mrb[11].mxu0  ;;  %v1249_v7 = vadd.f32 %v1243_v2, %v1225_v10 }
 0x562   :  { %v1461_v49 = vpop.f32.mrb[0].mxu1  ;;  %v1502_v51 = vpop.f32.mrb[12].mxu0 }
 0x563   :  { %v1792_v15 = vadd.f32 %v1791_v9, %v1461_v49  ;;  %v1463_v16 = vpop.f32.mrb[1].mxu1  ;;  %v1789_v33 = vpop.f32.mrb[13].mxu0  ;;  %v1503_v4 = vadd.f32 %v1502_v51, %v1295_v54 }
 0x564   :  { %v1465_v52 = vpop.f32.mrb[2].mxu1  ;;  %v1505_v34 = vpop.f32.mrb[14].mxu0  ;;  %v1794_v60 = vadd.f32 %v1793_v50, %v1463_v16 }
 0x565   :  { %v1673_v57 = vmul.f32 -1.442695, %v1792_v15  ;;  %v1466_v58 = vpop.f32.mrb[3].mxu1  ;;  %v1790_v59 = vpop.f32.mrb[15].mxu0 }
 0x566   :  { %v1674_v62 = vmul.f32 -1.442695, %v1794_v60 }
 0x567   :  { %1955 = vpow2.f32 %v1673_v57 }
 0x568   :  { %1957 = vpow2.f32 %v1674_v62 }
 0x571   :  { %v1956_v25 = vpop.eup %1955 }
 0x572   :  { %v1512_v63 = vadd.f32 1.0, %v1956_v25  ;;  %v1958_v1 = vpop.eup %1957 }
 0x573   :  { %v1519_v3 = vadd.f32 1.0, %v1958_v1 }
 0x574   :  { %1959 = vrcp.f32 %v1512_v63 }
 0x575   :  { %1961 = vrcp.f32 %v1519_v3 }
 0x57e   :  { %v1960_v6 = vpop.eup %1959 }
 0x57f   :  { %v1522_v8 = vmul.f32 %v1960_v6, %v1503_v4  ;;  %v1962_v12 = vpop.eup %1961 }
 0x580   :  { %v1525_v14 = vsub.f32 1.0, %v1962_v12  ;;  %v1527_v19 = vmul.f32 %v1965_v18, %v1962_v12 }
 0x581   :  { %v1523_v11 = vadd.f32 %v1522_v8, %v1249_v7 }
 0x583   :  { %1963 = vtanh.f32 %v1523_v11 }
 0x58d   :  { %v1964_v17 = vpop.eup %1963 }
 0x58e   :  { %v1526_v23 = vmul.f32 %v1964_v17, %v1525_v14 }
 0x590   :  { %v1528_v24 = vadd.f32 %v1527_v19, %v1526_v23 }
 0x592   :  { %1529 = vst [vmem:[%s2560_s13] sm:$0xff] %v1528_v24 }
 0x593   :  { %2058 = dma.done.wait [#allocation5], 128  }
 0x594   :  { %2059 = vsyncadd [#allocation5], 4294967168 }
 0x595   :  { %1588 = vsyncpa [#allocation4], 1 }
 0x596   :  { %1589 = vsyncpa [#allocation7], 1 }
 0x597   :  { %1590 = vsyncpa [#allocation5], 1 }

</bundles_post_ra>
